<compile_context>
chip_gen: v7x
topology: tpu7x:2x2x1
jax: 0.10.0
libtpu: 0.0.40
codegen_flags: <defaults>
</compile_context>

<pallas_src>
import functools

import jax
import jax.numpy as jnp
from jax.experimental import pallas as pl
from jax.experimental.pallas import tpu as pltpu

KSIZE = 5
PAD = 2
C1, C2, C3 = 16, 32, 64
BN_MAX = 128                       # samples per grid step (multiple of 8)


def _round_up(x, m):
    return (x + m - 1) // m * m


# --------------------------------------------------------------------------
# Fused kernel: conv1 -> conv2 -> conv3 -> (flatten+linear1) -> linear2 -> sigmoids
# Rows are laid out (pos, sample)-major inside each batch tile:
#   row = pos * bn + sample_within_tile
# so a shift of d positions is a shift of d*bn rows (bn is a multiple of 8),
# padding is just zero rows at the tile edges, and no masks are needed.
# --------------------------------------------------------------------------
def fused_cnn_kernel(x_ref,
                     w1_ref, b1_ref, w2_ref, b2_ref, w3_ref, b3_ref,
                     wl1_ref, bl1_ref, wl2_ref, bl2_ref,
                     out_ref, *, bn, length, use_bf16):
    mm_dtype = jnp.bfloat16 if use_bf16 else jnp.float32

    def shift(h, d):
        # Shift by d positions == d*bn rows; zero-fill the edge (== conv padding).
        if d == 0:
            return h
        pad = jnp.zeros((abs(d) * bn, h.shape[1]), h.dtype)
        if d > 0:
            return jnp.concatenate([h[d * bn:, :], pad], axis=0)
        return jnp.concatenate([pad, h[:d * bn, :]], axis=0)

    # ---- conv1 (Cin=1): 5-tap broadcast multiply-accumulate on the VPU ----
    x = x_ref[...]                                      # (bn*L, 1) f32
    w1 = w1_ref[...]                                    # (KSIZE, C1) f32
    acc = jnp.zeros((bn * length, C1), jnp.float32)
    for t in range(KSIZE):                              # static unroll over taps
        acc = acc + shift(x, t - PAD) * w1[t][None, :]
    h = jnp.maximum(acc + b1_ref[...], 0.0)             # (bn*L, 16)

    # ---- conv2 / conv3: 5-tap matmul accumulate on the MXU (f32 acc) ----
    def conv_relu(h, w_ref, b_ref, cin, cout):
        hm = h.astype(mm_dtype)
        w = w_ref[...]                                  # (KSIZE*cin, cout), row = t*cin + ci
        acc = jnp.zeros((bn * length, cout), jnp.float32)
        for t in range(KSIZE):
            acc = acc + jnp.dot(shift(hm, t - PAD),
                                w[t * cin:(t + 1) * cin, :],
                                preferred_element_type=jnp.float32)
        return jnp.maximum(acc + b_ref[...], 0.0)

    h = conv_relu(h, w2_ref, b2_ref, C1, C2)            # (bn*L, 32)
    h = conv_relu(h, w3_ref, b3_ref, C2, C3)            # (bn*L, 64)

    # ---- flatten + Linear1 as a per-position matmul accumulation ----
    # wl1 was pre-permuted so rows l*C3 .. (l+1)*C3 are the weights of position l;
    # h[l*bn:(l+1)*bn, :] is a contiguous static slice (all samples at position l).
    hm = h.astype(mm_dtype)
    wl1 = wl1_ref[...]                                  # (L*C3, 64)
    z = jnp.zeros((bn, 64), jnp.float32)
    for l in range(length):
        z = z + jnp.dot(hm[l * bn:(l + 1) * bn, :],
                        wl1[l * C3:(l + 1) * C3, :],
                        preferred_element_type=jnp.float32)
    z = jnp.maximum(z + bl1_ref[...], 0.0)              # (bn, 64)

    # ---- Linear2 + double sigmoid ----
    z2 = jnp.dot(z.astype(mm_dtype), wl2_ref[...],
                 preferred_element_type=jnp.float32) + bl2_ref[...]
    z2 = jax.nn.sigmoid(z2)             # Sigmoid inside the nn.Sequential
    out_ref[...] = jax.nn.sigmoid(z2)   # extra self.sigmoid in forward()


# --------------------------------------------------------------------------
# Wrapper: host-side layout prep + single pallas_call.
# --------------------------------------------------------------------------
@functools.partial(jax.jit, static_argnames=("use_bf16",))
def cnn_forward(x, params, use_bf16=True):
    w1, b1, w2, b2, w3, b3, wl1, bl1, wl2, bl2 = params
    n, cin, length = x.shape
    assert cin == 1

    bn = min(BN_MAX, _round_up(n, 8))       # samples per grid step (multiple of 8)
    n_pad = _round_up(n, bn)                # pad the batch instead of asserting
    grid = (n_pad // bn,)
    mm_dtype = jnp.bfloat16 if use_bf16 else jnp.float32

    # (pos, sample)-major layout per batch tile:
    #   global row = tile*(L*bn) + pos*bn + sample_within_tile
    x2 = x.astype(jnp.float32).reshape(n, length)
    x2 = jnp.pad(x2, ((0, n_pad - n), (0, 0)))
    x_t = (x2.reshape(n_pad // bn, bn, length)
             .transpose(0, 2, 1)
             .reshape(n_pad * length, 1))

    # conv weights: (Cout, Cin, K) -> (K*Cin, Cout), row = t*Cin + ci
    def conv_w(w):
        cout, ci, k = w.shape
        return jnp.transpose(w, (2, 1, 0)).reshape(k * ci, cout)

    w1m = jnp.transpose(w1.reshape(C1, KSIZE), (1, 0))          # (K, C1), f32
    w2m = conv_w(w2).astype(mm_dtype)
    w3m = conv_w(w3).astype(mm_dtype)
    b1m, b2m, b3m = b1.reshape(1, -1), b2.reshape(1, -1), b3.reshape(1, -1)

    # First Linear weight permuted from torch flatten order (c*L + l) to the
    # kernel's per-position order (l*C3 + c).
    wl1p = (wl1.reshape(C3, length, -1)
               .transpose(1, 0, 2)
               .reshape(length * C3, -1)
               .astype(mm_dtype))
    wl2m = wl2.astype(mm_dtype)
    bl1m, bl2m = bl1.reshape(1, -1), bl2.reshape(1, -1)

    def full2(a):                           # whole (2-D) array resident in VMEM
        return pl.BlockSpec(a.shape, lambda i: (0, 0))

    kernel = functools.partial(fused_cnn_kernel, bn=bn, length=length,
                               use_bf16=use_bf16)
    out = pl.pallas_call(
        kernel,
        out_shape=jax.ShapeDtypeStruct((n_pad, 2), jnp.float32),
        grid=grid,
        in_specs=[
            pl.BlockSpec((bn * length, 1), lambda i: (i, 0)),   # x, (pos,sample)-major
            full2(w1m), full2(b1m),
            full2(w2m), full2(b2m),
            full2(w3m), full2(b3m),
            full2(wl1p), full2(bl1m),
            full2(wl2m), full2(bl2m),
        ],
        out_specs=pl.BlockSpec((bn, 2), lambda i: (i, 0)),
        compiler_params=pltpu.CompilerParams(dimension_semantics=("parallel",)),
    )(x_t, w1m, b1m, w2m, b2m, w3m, b3m, wl1p, bl1m, wl2m, bl2m)
    return out[:n]


# --------------------------------------------------------------------------
# Deterministic parameter init (PyTorch-layout weights, synthetic values).
# --------------------------------------------------------------------------
def init_params(key, length):
    ks = jax.random.split(key, 10)

    def u(k, shape, fan_in):
        bound = float(fan_in) ** -0.5
        return jax.random.uniform(k, shape, jnp.float32, -bound, bound)

    w1 = u(ks[0], (C1, 1, KSIZE), 1 * KSIZE)
    b1 = u(ks[1], (C1,), 1 * KSIZE)
    w2 = u(ks[2], (C2, C1, KSIZE), C1 * KSIZE)
    b2 = u(ks[3], (C2,), C1 * KSIZE)
    w3 = u(ks[4], (C3, C2, KSIZE), C2 * KSIZE)
    b3 = u(ks[5], (C3,), C2 * KSIZE)
    flat_in = C3 * length                    # LazyLinear infers 64*L
    wl1 = u(ks[6], (flat_in, 64), flat_in)   # stored (in, out) for x @ W
    bl1 = u(ks[7], (64,), flat_in)
    wl2 = u(ks[8], (64, 2), 64)
    bl2 = u(ks[9], (2,), 64)
    return (w1, b1, w2, b2, w3, b3, wl1, bl1, wl2, bl2)


# --------------------------------------------------------------------------
# Pure-JAX reference (lax.conv) to validate the fused kernel.
# --------------------------------------------------------------------------
def reference_forward(x, params):
    w1, b1, w2, b2, w3, b3, wl1, bl1, wl2, bl2 = params

    def conv_relu(h, w, b):
        y = jax.lax.conv_general_dilated(
            h, w, window_strides=(1,), padding=((PAD, PAD),),
            dimension_numbers=("NCH", "OIH", "NCH"))
        return jnp.maximum(y + b.reshape(1, -1, 1), 0.0)

    h = conv_relu(x, w1, b1)
    h = conv_relu(h, w2, b2)
    h = conv_relu(h, w3, b3)
    f = h.reshape(h.shape[0], -1)            # torch channel-major flatten
    z = jnp.maximum(f @ wl1 + bl1, 0.0)
    z = jax.nn.sigmoid(z @ wl2 + bl2)
    return jax.nn.sigmoid(z)


if __name__ == "__main__":
    L = 16
    key = jax.random.PRNGKey(0)
    kx, kp, kx2 = jax.random.split(key, 3)
    params = init_params(kp, L)

    # Small shape consistent with the module: (batch=2, channels=1, length=16).
    x = jax.random.normal(kx, (2, 1, L), jnp.float32)
    ref = reference_forward(x, params)

    # bf16-MXU path (the fast path).
    out = jax.block_until_ready(cnn_forward(x, params, use_bf16=True))
    assert out.shape == (2, 2), out.shape
    err_bf16 = float(jnp.max(jnp.abs(out - ref)))
    assert err_bf16 < 2e-2, f"bf16 path mismatch vs reference: {err_bf16}"

    # fp32 path: strict numerical check of the layout / tap-shift / permutation logic.
    out_f32 = jax.block_until_ready(cnn_forward(x, params, use_bf16=False))
    err_f32 = float(jnp.max(jnp.abs(out_f32 - ref)))
    assert err_f32 < 1e-4, f"fp32 path mismatch vs reference: {err_f32}"

    # Larger, non-multiple batch: exercises bn=128 tiles, padding and grid > 1.
    xb = jax.random.normal(kx2, (200, 1, L), jnp.float32)
    out_b = jax.block_until_ready(cnn_forward(xb, params, use_bf16=True))
    err_b = float(jnp.max(jnp.abs(out_b - reference_forward(xb, params))))
    assert out_b.shape == (200, 2) and err_b < 2e-2, (out_b.shape, err_b)

    print("KERNEL_OK")
</pallas_src>

<mosaic_0001>
module attributes {stable_mosaic.version = 11 : i64} {
  func.func @fused_cnn_kernel(%arg0: i32, %arg1: memref<128x1xf32, #tpu.memory_space<vmem>>, %arg2: memref<5x16xf32, #tpu.memory_space<vmem>>, %arg3: memref<1x16xf32, #tpu.memory_space<vmem>>, %arg4: memref<80x32xbf16, #tpu.memory_space<vmem>>, %arg5: memref<1x32xf32, #tpu.memory_space<vmem>>, %arg6: memref<160x64xbf16, #tpu.memory_space<vmem>>, %arg7: memref<1x64xf32, #tpu.memory_space<vmem>>, %arg8: memref<1024x64xbf16, #tpu.memory_space<vmem>>, %arg9: memref<1x64xf32, #tpu.memory_space<vmem>>, %arg10: memref<64x2xbf16, #tpu.memory_space<vmem>>, %arg11: memref<1x2xf32, #tpu.memory_space<vmem>>, %arg12: memref<8x2xf32, #tpu.memory_space<vmem>>) attributes {dimension_semantics = [#tpu.dimension_semantics<parallel>], iteration_bounds = array<i64: 1>, scalar_prefetch = 0 : i64, scratch_operands = 0 : i64, tpu.core_type = #tpu.core_type<tc>, window_params = [{transform_indices = @transform_0, window_bounds = array<i64: 128, 1>}, {pipeline_mode = #tpu.pipeline_mode<synchronous>, transform_indices = @transform_1, window_bounds = array<i64: 5, 16>}, {pipeline_mode = #tpu.pipeline_mode<synchronous>, transform_indices = @transform_2, window_bounds = array<i64: 1, 16>}, {pipeline_mode = #tpu.pipeline_mode<synchronous>, transform_indices = @transform_3, window_bounds = array<i64: 80, 32>}, {pipeline_mode = #tpu.pipeline_mode<synchronous>, transform_indices = @transform_4, window_bounds = array<i64: 1, 32>}, {pipeline_mode = #tpu.pipeline_mode<synchronous>, transform_indices = @transform_5, window_bounds = array<i64: 160, 64>}, {pipeline_mode = #tpu.pipeline_mode<synchronous>, transform_indices = @transform_6, window_bounds = array<i64: 1, 64>}, {pipeline_mode = #tpu.pipeline_mode<synchronous>, transform_indices = @transform_7, window_bounds = array<i64: 1024, 64>}, {pipeline_mode = #tpu.pipeline_mode<synchronous>, transform_indices = @transform_8, window_bounds = array<i64: 1, 64>}, {pipeline_mode = #tpu.pipeline_mode<synchronous>, transform_indices = @transform_9, window_bounds = array<i64: 64, 2>}, {pipeline_mode = #tpu.pipeline_mode<synchronous>, transform_indices = @transform_10, window_bounds = array<i64: 1, 2>}, {transform_indices = @transform_11, window_bounds = array<i64: 8, 2>}]} {
    %c0 = arith.constant 0 : index
    %c0_0 = arith.constant 0 : index
    %0 = vector.load %arg1[%c0, %c0_0] : memref<128x1xf32, #tpu.memory_space<vmem>>, vector<128x1xf32>
    %c0_1 = arith.constant 0 : index
    %c0_2 = arith.constant 0 : index
    %1 = vector.load %arg2[%c0_1, %c0_2] : memref<5x16xf32, #tpu.memory_space<vmem>>, vector<5x16xf32>
    %cst = arith.constant 0.000000e+00 : f32
    %2 = vector.broadcast %cst : f32 to vector<128x16xf32>
    %cst_3 = arith.constant 0.000000e+00 : f32
    %3 = vector.broadcast %cst_3 : f32 to vector<16x1xf32>
    %4 = vector.extract_strided_slice %0 {offsets = [0, 0], sizes = [112, 1], strides = [1, 1]} : vector<128x1xf32> to vector<112x1xf32>
    %5 = tpu.concatenate %3, %4 in 0 : vector<16x1xf32>, vector<112x1xf32> -> vector<128x1xf32>
    %6 = vector.extract_strided_slice %1 {offsets = [0, 0], sizes = [1, 16], strides = [1, 1]} : vector<5x16xf32> to vector<1x16xf32>
    %7 = vector.shape_cast %6 : vector<1x16xf32> to vector<16xf32>
    %8 = vector.shape_cast %7 : vector<16xf32> to vector<1x16xf32>
    %9 = vector.broadcast %5 : vector<128x1xf32> to vector<128x16xf32>
    %10 = vector.broadcast %8 : vector<1x16xf32> to vector<128x16xf32>
    %11 = arith.mulf %9, %10 : vector<128x16xf32>
    %12 = arith.addf %2, %11 : vector<128x16xf32>
    %cst_4 = arith.constant 0.000000e+00 : f32
    %13 = vector.broadcast %cst_4 : f32 to vector<8x1xf32>
    %14 = vector.extract_strided_slice %0 {offsets = [0, 0], sizes = [120, 1], strides = [1, 1]} : vector<128x1xf32> to vector<120x1xf32>
    %15 = tpu.concatenate %13, %14 in 0 : vector<8x1xf32>, vector<120x1xf32> -> vector<128x1xf32>
    %16 = vector.extract_strided_slice %1 {offsets = [1, 0], sizes = [1, 16], strides = [1, 1]} : vector<5x16xf32> to vector<1x16xf32>
    %17 = vector.shape_cast %16 : vector<1x16xf32> to vector<16xf32>
    %18 = vector.shape_cast %17 : vector<16xf32> to vector<1x16xf32>
    %19 = vector.broadcast %15 : vector<128x1xf32> to vector<128x16xf32>
    %20 = vector.broadcast %18 : vector<1x16xf32> to vector<128x16xf32>
    %21 = arith.mulf %19, %20 : vector<128x16xf32>
    %22 = arith.addf %12, %21 : vector<128x16xf32>
    %23 = vector.extract_strided_slice %1 {offsets = [2, 0], sizes = [1, 16], strides = [1, 1]} : vector<5x16xf32> to vector<1x16xf32>
    %24 = vector.shape_cast %23 : vector<1x16xf32> to vector<16xf32>
    %25 = vector.shape_cast %24 : vector<16xf32> to vector<1x16xf32>
    %26 = vector.broadcast %0 : vector<128x1xf32> to vector<128x16xf32>
    %27 = vector.broadcast %25 : vector<1x16xf32> to vector<128x16xf32>
    %28 = arith.mulf %26, %27 : vector<128x16xf32>
    %29 = arith.addf %22, %28 : vector<128x16xf32>
    %cst_5 = arith.constant 0.000000e+00 : f32
    %30 = vector.broadcast %cst_5 : f32 to vector<8x1xf32>
    %31 = vector.extract_strided_slice %0 {offsets = [8, 0], sizes = [120, 1], strides = [1, 1]} : vector<128x1xf32> to vector<120x1xf32>
    %32 = tpu.concatenate %31, %30 in 0 : vector<120x1xf32>, vector<8x1xf32> -> vector<128x1xf32>
    %33 = vector.extract_strided_slice %1 {offsets = [3, 0], sizes = [1, 16], strides = [1, 1]} : vector<5x16xf32> to vector<1x16xf32>
    %34 = vector.shape_cast %33 : vector<1x16xf32> to vector<16xf32>
    %35 = vector.shape_cast %34 : vector<16xf32> to vector<1x16xf32>
    %36 = vector.broadcast %32 : vector<128x1xf32> to vector<128x16xf32>
    %37 = vector.broadcast %35 : vector<1x16xf32> to vector<128x16xf32>
    %38 = arith.mulf %36, %37 : vector<128x16xf32>
    %39 = arith.addf %29, %38 : vector<128x16xf32>
    %cst_6 = arith.constant 0.000000e+00 : f32
    %40 = vector.broadcast %cst_6 : f32 to vector<16x1xf32>
    %41 = vector.extract_strided_slice %0 {offsets = [16, 0], sizes = [112, 1], strides = [1, 1]} : vector<128x1xf32> to vector<112x1xf32>
    %42 = tpu.concatenate %41, %40 in 0 : vector<112x1xf32>, vector<16x1xf32> -> vector<128x1xf32>
    %43 = vector.extract_strided_slice %1 {offsets = [4, 0], sizes = [1, 16], strides = [1, 1]} : vector<5x16xf32> to vector<1x16xf32>
    %44 = vector.shape_cast %43 : vector<1x16xf32> to vector<16xf32>
    %45 = vector.shape_cast %44 : vector<16xf32> to vector<1x16xf32>
    %46 = vector.broadcast %42 : vector<128x1xf32> to vector<128x16xf32>
    %47 = vector.broadcast %45 : vector<1x16xf32> to vector<128x16xf32>
    %48 = arith.mulf %46, %47 : vector<128x16xf32>
    %49 = arith.addf %39, %48 : vector<128x16xf32>
    %c0_7 = arith.constant 0 : index
    %c0_8 = arith.constant 0 : index
    %50 = vector.load %arg3[%c0_7, %c0_8] : memref<1x16xf32, #tpu.memory_space<vmem>>, vector<1x16xf32>
    %51 = vector.broadcast %50 : vector<1x16xf32> to vector<128x16xf32>
    %52 = arith.addf %49, %51 : vector<128x16xf32>
    %cst_9 = arith.constant 0.000000e+00 : f32
    %53 = vector.broadcast %cst_9 : f32 to vector<128x16xf32>
    %54 = arith.maximumf %52, %53 : vector<128x16xf32>
    %55 = arith.truncf %54 : vector<128x16xf32> to vector<128x16xbf16>
    %c0_10 = arith.constant 0 : index
    %c0_11 = arith.constant 0 : index
    %56 = vector.load %arg4[%c0_10, %c0_11] : memref<80x32xbf16, #tpu.memory_space<vmem>>, vector<80x32xbf16>
    %cst_12 = arith.constant 0.000000e+00 : f32
    %57 = vector.broadcast %cst_12 : f32 to vector<128x32xf32>
    %cst_13 = arith.constant 0.000000e+00 : bf16
    %58 = vector.broadcast %cst_13 : bf16 to vector<16x16xbf16>
    %59 = vector.extract_strided_slice %55 {offsets = [0, 0], sizes = [112, 16], strides = [1, 1]} : vector<128x16xbf16> to vector<112x16xbf16>
    %60 = tpu.concatenate %58, %59 in 0 : vector<16x16xbf16>, vector<112x16xbf16> -> vector<128x16xbf16>
    %61 = vector.extract_strided_slice %56 {offsets = [0, 0], sizes = [16, 32], strides = [1, 1]} : vector<80x32xbf16> to vector<16x32xbf16>
    %cst_14 = arith.constant dense<0.000000e+00> : vector<128x32xf32>
    %62 = tpu.matmul %60, %61, %cst_14 {dimension_numbers = #tpu.dot_dimension_numbers<[1], [0], [0], [1], [0, 0, 1, 1], [], []>} : vector<128x16xbf16>, vector<16x32xbf16>, vector<128x32xf32> -> vector<128x32xf32>
    %63 = arith.addf %57, %62 : vector<128x32xf32>
    %cst_15 = arith.constant 0.000000e+00 : bf16
    %64 = vector.broadcast %cst_15 : bf16 to vector<8x16xbf16>
    %65 = vector.extract_strided_slice %55 {offsets = [0, 0], sizes = [120, 16], strides = [1, 1]} : vector<128x16xbf16> to vector<120x16xbf16>
    %66 = tpu.concatenate %64, %65 in 0 : vector<8x16xbf16>, vector<120x16xbf16> -> vector<128x16xbf16>
    %67 = vector.extract_strided_slice %56 {offsets = [16, 0], sizes = [16, 32], strides = [1, 1]} : vector<80x32xbf16> to vector<16x32xbf16>
    %cst_16 = arith.constant dense<0.000000e+00> : vector<128x32xf32>
    %68 = tpu.matmul %66, %67, %cst_16 {dimension_numbers = #tpu.dot_dimension_numbers<[1], [0], [0], [1], [0, 0, 1, 1], [], []>} : vector<128x16xbf16>, vector<16x32xbf16>, vector<128x32xf32> -> vector<128x32xf32>
    %69 = arith.addf %63, %68 : vector<128x32xf32>
    %70 = vector.extract_strided_slice %56 {offsets = [32, 0], sizes = [16, 32], strides = [1, 1]} : vector<80x32xbf16> to vector<16x32xbf16>
    %cst_17 = arith.constant dense<0.000000e+00> : vector<128x32xf32>
    %71 = tpu.matmul %55, %70, %cst_17 {dimension_numbers = #tpu.dot_dimension_numbers<[1], [0], [0], [1], [0, 0, 1, 1], [], []>} : vector<128x16xbf16>, vector<16x32xbf16>, vector<128x32xf32> -> vector<128x32xf32>
    %72 = arith.addf %69, %71 : vector<128x32xf32>
    %cst_18 = arith.constant 0.000000e+00 : bf16
    %73 = vector.broadcast %cst_18 : bf16 to vector<8x16xbf16>
    %74 = vector.extract_strided_slice %55 {offsets = [8, 0], sizes = [120, 16], strides = [1, 1]} : vector<128x16xbf16> to vector<120x16xbf16>
    %75 = tpu.concatenate %74, %73 in 0 : vector<120x16xbf16>, vector<8x16xbf16> -> vector<128x16xbf16>
    %76 = vector.extract_strided_slice %56 {offsets = [48, 0], sizes = [16, 32], strides = [1, 1]} : vector<80x32xbf16> to vector<16x32xbf16>
    %cst_19 = arith.constant dense<0.000000e+00> : vector<128x32xf32>
    %77 = tpu.matmul %75, %76, %cst_19 {dimension_numbers = #tpu.dot_dimension_numbers<[1], [0], [0], [1], [0, 0, 1, 1], [], []>} : vector<128x16xbf16>, vector<16x32xbf16>, vector<128x32xf32> -> vector<128x32xf32>
    %78 = arith.addf %72, %77 : vector<128x32xf32>
    %cst_20 = arith.constant 0.000000e+00 : bf16
    %79 = vector.broadcast %cst_20 : bf16 to vector<16x16xbf16>
    %80 = vector.extract_strided_slice %55 {offsets = [16, 0], sizes = [112, 16], strides = [1, 1]} : vector<128x16xbf16> to vector<112x16xbf16>
    %81 = tpu.concatenate %80, %79 in 0 : vector<112x16xbf16>, vector<16x16xbf16> -> vector<128x16xbf16>
    %82 = vector.extract_strided_slice %56 {offsets = [64, 0], sizes = [16, 32], strides = [1, 1]} : vector<80x32xbf16> to vector<16x32xbf16>
    %cst_21 = arith.constant dense<0.000000e+00> : vector<128x32xf32>
    %83 = tpu.matmul %81, %82, %cst_21 {dimension_numbers = #tpu.dot_dimension_numbers<[1], [0], [0], [1], [0, 0, 1, 1], [], []>} : vector<128x16xbf16>, vector<16x32xbf16>, vector<128x32xf32> -> vector<128x32xf32>
    %84 = arith.addf %78, %83 : vector<128x32xf32>
    %c0_22 = arith.constant 0 : index
    %c0_23 = arith.constant 0 : index
    %85 = vector.load %arg5[%c0_22, %c0_23] : memref<1x32xf32, #tpu.memory_space<vmem>>, vector<1x32xf32>
    %86 = vector.broadcast %85 : vector<1x32xf32> to vector<128x32xf32>
    %87 = arith.addf %84, %86 : vector<128x32xf32>
    %cst_24 = arith.constant 0.000000e+00 : f32
    %88 = vector.broadcast %cst_24 : f32 to vector<128x32xf32>
    %89 = arith.maximumf %87, %88 : vector<128x32xf32>
    %90 = arith.truncf %89 : vector<128x32xf32> to vector<128x32xbf16>
    %c0_25 = arith.constant 0 : index
    %c0_26 = arith.constant 0 : index
    %91 = vector.load %arg6[%c0_25, %c0_26] : memref<160x64xbf16, #tpu.memory_space<vmem>>, vector<160x64xbf16>
    %cst_27 = arith.constant 0.000000e+00 : f32
    %92 = vector.broadcast %cst_27 : f32 to vector<128x64xf32>
    %cst_28 = arith.constant 0.000000e+00 : bf16
    %93 = vector.broadcast %cst_28 : bf16 to vector<16x32xbf16>
    %94 = vector.extract_strided_slice %90 {offsets = [0, 0], sizes = [112, 32], strides = [1, 1]} : vector<128x32xbf16> to vector<112x32xbf16>
    %95 = tpu.concatenate %93, %94 in 0 : vector<16x32xbf16>, vector<112x32xbf16> -> vector<128x32xbf16>
    %96 = vector.extract_strided_slice %91 {offsets = [0, 0], sizes = [32, 64], strides = [1, 1]} : vector<160x64xbf16> to vector<32x64xbf16>
    %cst_29 = arith.constant dense<0.000000e+00> : vector<128x64xf32>
    %97 = tpu.matmul %95, %96, %cst_29 {dimension_numbers = #tpu.dot_dimension_numbers<[1], [0], [0], [1], [0, 0, 1, 1], [], []>} : vector<128x32xbf16>, vector<32x64xbf16>, vector<128x64xf32> -> vector<128x64xf32>
    %98 = arith.addf %92, %97 : vector<128x64xf32>
    %cst_30 = arith.constant 0.000000e+00 : bf16
    %99 = vector.broadcast %cst_30 : bf16 to vector<8x32xbf16>
    %100 = vector.extract_strided_slice %90 {offsets = [0, 0], sizes = [120, 32], strides = [1, 1]} : vector<128x32xbf16> to vector<120x32xbf16>
    %101 = tpu.concatenate %99, %100 in 0 : vector<8x32xbf16>, vector<120x32xbf16> -> vector<128x32xbf16>
    %102 = vector.extract_strided_slice %91 {offsets = [32, 0], sizes = [32, 64], strides = [1, 1]} : vector<160x64xbf16> to vector<32x64xbf16>
    %cst_31 = arith.constant dense<0.000000e+00> : vector<128x64xf32>
    %103 = tpu.matmul %101, %102, %cst_31 {dimension_numbers = #tpu.dot_dimension_numbers<[1], [0], [0], [1], [0, 0, 1, 1], [], []>} : vector<128x32xbf16>, vector<32x64xbf16>, vector<128x64xf32> -> vector<128x64xf32>
    %104 = arith.addf %98, %103 : vector<128x64xf32>
    %105 = vector.extract_strided_slice %91 {offsets = [64, 0], sizes = [32, 64], strides = [1, 1]} : vector<160x64xbf16> to vector<32x64xbf16>
    %cst_32 = arith.constant dense<0.000000e+00> : vector<128x64xf32>
    %106 = tpu.matmul %90, %105, %cst_32 {dimension_numbers = #tpu.dot_dimension_numbers<[1], [0], [0], [1], [0, 0, 1, 1], [], []>} : vector<128x32xbf16>, vector<32x64xbf16>, vector<128x64xf32> -> vector<128x64xf32>
    %107 = arith.addf %104, %106 : vector<128x64xf32>
    %cst_33 = arith.constant 0.000000e+00 : bf16
    %108 = vector.broadcast %cst_33 : bf16 to vector<8x32xbf16>
    %109 = vector.extract_strided_slice %90 {offsets = [8, 0], sizes = [120, 32], strides = [1, 1]} : vector<128x32xbf16> to vector<120x32xbf16>
    %110 = tpu.concatenate %109, %108 in 0 : vector<120x32xbf16>, vector<8x32xbf16> -> vector<128x32xbf16>
    %111 = vector.extract_strided_slice %91 {offsets = [96, 0], sizes = [32, 64], strides = [1, 1]} : vector<160x64xbf16> to vector<32x64xbf16>
    %cst_34 = arith.constant dense<0.000000e+00> : vector<128x64xf32>
    %112 = tpu.matmul %110, %111, %cst_34 {dimension_numbers = #tpu.dot_dimension_numbers<[1], [0], [0], [1], [0, 0, 1, 1], [], []>} : vector<128x32xbf16>, vector<32x64xbf16>, vector<128x64xf32> -> vector<128x64xf32>
    %113 = arith.addf %107, %112 : vector<128x64xf32>
    %cst_35 = arith.constant 0.000000e+00 : bf16
    %114 = vector.broadcast %cst_35 : bf16 to vector<16x32xbf16>
    %115 = vector.extract_strided_slice %90 {offsets = [16, 0], sizes = [112, 32], strides = [1, 1]} : vector<128x32xbf16> to vector<112x32xbf16>
    %116 = tpu.concatenate %115, %114 in 0 : vector<112x32xbf16>, vector<16x32xbf16> -> vector<128x32xbf16>
    %117 = vector.extract_strided_slice %91 {offsets = [128, 0], sizes = [32, 64], strides = [1, 1]} : vector<160x64xbf16> to vector<32x64xbf16>
    %cst_36 = arith.constant dense<0.000000e+00> : vector<128x64xf32>
    %118 = tpu.matmul %116, %117, %cst_36 {dimension_numbers = #tpu.dot_dimension_numbers<[1], [0], [0], [1], [0, 0, 1, 1], [], []>} : vector<128x32xbf16>, vector<32x64xbf16>, vector<128x64xf32> -> vector<128x64xf32>
    %119 = arith.addf %113, %118 : vector<128x64xf32>
    %c0_37 = arith.constant 0 : index
    %c0_38 = arith.constant 0 : index
    %120 = vector.load %arg7[%c0_37, %c0_38] : memref<1x64xf32, #tpu.memory_space<vmem>>, vector<1x64xf32>
    %121 = vector.broadcast %120 : vector<1x64xf32> to vector<128x64xf32>
    %122 = arith.addf %119, %121 : vector<128x64xf32>
    %cst_39 = arith.constant 0.000000e+00 : f32
    %123 = vector.broadcast %cst_39 : f32 to vector<128x64xf32>
    %124 = arith.maximumf %122, %123 : vector<128x64xf32>
    %125 = arith.truncf %124 : vector<128x64xf32> to vector<128x64xbf16>
    %c0_40 = arith.constant 0 : index
    %c0_41 = arith.constant 0 : index
    %126 = vector.load %arg8[%c0_40, %c0_41] : memref<1024x64xbf16, #tpu.memory_space<vmem>>, vector<1024x64xbf16>
    %cst_42 = arith.constant 0.000000e+00 : f32
    %127 = vector.broadcast %cst_42 : f32 to vector<8x64xf32>
    %128 = vector.extract_strided_slice %125 {offsets = [0, 0], sizes = [8, 64], strides = [1, 1]} : vector<128x64xbf16> to vector<8x64xbf16>
    %129 = vector.extract_strided_slice %126 {offsets = [0, 0], sizes = [64, 64], strides = [1, 1]} : vector<1024x64xbf16> to vector<64x64xbf16>
    %cst_43 = arith.constant dense<0.000000e+00> : vector<8x64xf32>
    %130 = tpu.matmul %128, %129, %cst_43 {dimension_numbers = #tpu.dot_dimension_numbers<[1], [0], [0], [1], [0, 0, 1, 1], [], []>} : vector<8x64xbf16>, vector<64x64xbf16>, vector<8x64xf32> -> vector<8x64xf32>
    %131 = arith.addf %127, %130 : vector<8x64xf32>
    %132 = vector.extract_strided_slice %125 {offsets = [8, 0], sizes = [8, 64], strides = [1, 1]} : vector<128x64xbf16> to vector<8x64xbf16>
    %133 = vector.extract_strided_slice %126 {offsets = [64, 0], sizes = [64, 64], strides = [1, 1]} : vector<1024x64xbf16> to vector<64x64xbf16>
    %cst_44 = arith.constant dense<0.000000e+00> : vector<8x64xf32>
    %134 = tpu.matmul %132, %133, %cst_44 {dimension_numbers = #tpu.dot_dimension_numbers<[1], [0], [0], [1], [0, 0, 1, 1], [], []>} : vector<8x64xbf16>, vector<64x64xbf16>, vector<8x64xf32> -> vector<8x64xf32>
    %135 = arith.addf %131, %134 : vector<8x64xf32>
    %136 = vector.extract_strided_slice %125 {offsets = [16, 0], sizes = [8, 64], strides = [1, 1]} : vector<128x64xbf16> to vector<8x64xbf16>
    %137 = vector.extract_strided_slice %126 {offsets = [128, 0], sizes = [64, 64], strides = [1, 1]} : vector<1024x64xbf16> to vector<64x64xbf16>
    %cst_45 = arith.constant dense<0.000000e+00> : vector<8x64xf32>
    %138 = tpu.matmul %136, %137, %cst_45 {dimension_numbers = #tpu.dot_dimension_numbers<[1], [0], [0], [1], [0, 0, 1, 1], [], []>} : vector<8x64xbf16>, vector<64x64xbf16>, vector<8x64xf32> -> vector<8x64xf32>
    %139 = arith.addf %135, %138 : vector<8x64xf32>
    %140 = vector.extract_strided_slice %125 {offsets = [24, 0], sizes = [8, 64], strides = [1, 1]} : vector<128x64xbf16> to vector<8x64xbf16>
    %141 = vector.extract_strided_slice %126 {offsets = [192, 0], sizes = [64, 64], strides = [1, 1]} : vector<1024x64xbf16> to vector<64x64xbf16>
    %cst_46 = arith.constant dense<0.000000e+00> : vector<8x64xf32>
    %142 = tpu.matmul %140, %141, %cst_46 {dimension_numbers = #tpu.dot_dimension_numbers<[1], [0], [0], [1], [0, 0, 1, 1], [], []>} : vector<8x64xbf16>, vector<64x64xbf16>, vector<8x64xf32> -> vector<8x64xf32>
    %143 = arith.addf %139, %142 : vector<8x64xf32>
    %144 = vector.extract_strided_slice %125 {offsets = [32, 0], sizes = [8, 64], strides = [1, 1]} : vector<128x64xbf16> to vector<8x64xbf16>
    %145 = vector.extract_strided_slice %126 {offsets = [256, 0], sizes = [64, 64], strides = [1, 1]} : vector<1024x64xbf16> to vector<64x64xbf16>
    %cst_47 = arith.constant dense<0.000000e+00> : vector<8x64xf32>
    %146 = tpu.matmul %144, %145, %cst_47 {dimension_numbers = #tpu.dot_dimension_numbers<[1], [0], [0], [1], [0, 0, 1, 1], [], []>} : vector<8x64xbf16>, vector<64x64xbf16>, vector<8x64xf32> -> vector<8x64xf32>
    %147 = arith.addf %143, %146 : vector<8x64xf32>
    %148 = vector.extract_strided_slice %125 {offsets = [40, 0], sizes = [8, 64], strides = [1, 1]} : vector<128x64xbf16> to vector<8x64xbf16>
    %149 = vector.extract_strided_slice %126 {offsets = [320, 0], sizes = [64, 64], strides = [1, 1]} : vector<1024x64xbf16> to vector<64x64xbf16>
    %cst_48 = arith.constant dense<0.000000e+00> : vector<8x64xf32>
    %150 = tpu.matmul %148, %149, %cst_48 {dimension_numbers = #tpu.dot_dimension_numbers<[1], [0], [0], [1], [0, 0, 1, 1], [], []>} : vector<8x64xbf16>, vector<64x64xbf16>, vector<8x64xf32> -> vector<8x64xf32>
    %151 = arith.addf %147, %150 : vector<8x64xf32>
    %152 = vector.extract_strided_slice %125 {offsets = [48, 0], sizes = [8, 64], strides = [1, 1]} : vector<128x64xbf16> to vector<8x64xbf16>
    %153 = vector.extract_strided_slice %126 {offsets = [384, 0], sizes = [64, 64], strides = [1, 1]} : vector<1024x64xbf16> to vector<64x64xbf16>
    %cst_49 = arith.constant dense<0.000000e+00> : vector<8x64xf32>
    %154 = tpu.matmul %152, %153, %cst_49 {dimension_numbers = #tpu.dot_dimension_numbers<[1], [0], [0], [1], [0, 0, 1, 1], [], []>} : vector<8x64xbf16>, vector<64x64xbf16>, vector<8x64xf32> -> vector<8x64xf32>
    %155 = arith.addf %151, %154 : vector<8x64xf32>
    %156 = vector.extract_strided_slice %125 {offsets = [56, 0], sizes = [8, 64], strides = [1, 1]} : vector<128x64xbf16> to vector<8x64xbf16>
    %157 = vector.extract_strided_slice %126 {offsets = [448, 0], sizes = [64, 64], strides = [1, 1]} : vector<1024x64xbf16> to vector<64x64xbf16>
    %cst_50 = arith.constant dense<0.000000e+00> : vector<8x64xf32>
    %158 = tpu.matmul %156, %157, %cst_50 {dimension_numbers = #tpu.dot_dimension_numbers<[1], [0], [0], [1], [0, 0, 1, 1], [], []>} : vector<8x64xbf16>, vector<64x64xbf16>, vector<8x64xf32> -> vector<8x64xf32>
    %159 = arith.addf %155, %158 : vector<8x64xf32>
    %160 = vector.extract_strided_slice %125 {offsets = [64, 0], sizes = [8, 64], strides = [1, 1]} : vector<128x64xbf16> to vector<8x64xbf16>
    %161 = vector.extract_strided_slice %126 {offsets = [512, 0], sizes = [64, 64], strides = [1, 1]} : vector<1024x64xbf16> to vector<64x64xbf16>
    %cst_51 = arith.constant dense<0.000000e+00> : vector<8x64xf32>
    %162 = tpu.matmul %160, %161, %cst_51 {dimension_numbers = #tpu.dot_dimension_numbers<[1], [0], [0], [1], [0, 0, 1, 1], [], []>} : vector<8x64xbf16>, vector<64x64xbf16>, vector<8x64xf32> -> vector<8x64xf32>
    %163 = arith.addf %159, %162 : vector<8x64xf32>
    %164 = vector.extract_strided_slice %125 {offsets = [72, 0], sizes = [8, 64], strides = [1, 1]} : vector<128x64xbf16> to vector<8x64xbf16>
    %165 = vector.extract_strided_slice %126 {offsets = [576, 0], sizes = [64, 64], strides = [1, 1]} : vector<1024x64xbf16> to vector<64x64xbf16>
    %cst_52 = arith.constant dense<0.000000e+00> : vector<8x64xf32>
    %166 = tpu.matmul %164, %165, %cst_52 {dimension_numbers = #tpu.dot_dimension_numbers<[1], [0], [0], [1], [0, 0, 1, 1], [], []>} : vector<8x64xbf16>, vector<64x64xbf16>, vector<8x64xf32> -> vector<8x64xf32>
    %167 = arith.addf %163, %166 : vector<8x64xf32>
    %168 = vector.extract_strided_slice %125 {offsets = [80, 0], sizes = [8, 64], strides = [1, 1]} : vector<128x64xbf16> to vector<8x64xbf16>
    %169 = vector.extract_strided_slice %126 {offsets = [640, 0], sizes = [64, 64], strides = [1, 1]} : vector<1024x64xbf16> to vector<64x64xbf16>
    %cst_53 = arith.constant dense<0.000000e+00> : vector<8x64xf32>
    %170 = tpu.matmul %168, %169, %cst_53 {dimension_numbers = #tpu.dot_dimension_numbers<[1], [0], [0], [1], [0, 0, 1, 1], [], []>} : vector<8x64xbf16>, vector<64x64xbf16>, vector<8x64xf32> -> vector<8x64xf32>
    %171 = arith.addf %167, %170 : vector<8x64xf32>
    %172 = vector.extract_strided_slice %125 {offsets = [88, 0], sizes = [8, 64], strides = [1, 1]} : vector<128x64xbf16> to vector<8x64xbf16>
    %173 = vector.extract_strided_slice %126 {offsets = [704, 0], sizes = [64, 64], strides = [1, 1]} : vector<1024x64xbf16> to vector<64x64xbf16>
    %cst_54 = arith.constant dense<0.000000e+00> : vector<8x64xf32>
    %174 = tpu.matmul %172, %173, %cst_54 {dimension_numbers = #tpu.dot_dimension_numbers<[1], [0], [0], [1], [0, 0, 1, 1], [], []>} : vector<8x64xbf16>, vector<64x64xbf16>, vector<8x64xf32> -> vector<8x64xf32>
    %175 = arith.addf %171, %174 : vector<8x64xf32>
    %176 = vector.extract_strided_slice %125 {offsets = [96, 0], sizes = [8, 64], strides = [1, 1]} : vector<128x64xbf16> to vector<8x64xbf16>
    %177 = vector.extract_strided_slice %126 {offsets = [768, 0], sizes = [64, 64], strides = [1, 1]} : vector<1024x64xbf16> to vector<64x64xbf16>
    %cst_55 = arith.constant dense<0.000000e+00> : vector<8x64xf32>
    %178 = tpu.matmul %176, %177, %cst_55 {dimension_numbers = #tpu.dot_dimension_numbers<[1], [0], [0], [1], [0, 0, 1, 1], [], []>} : vector<8x64xbf16>, vector<64x64xbf16>, vector<8x64xf32> -> vector<8x64xf32>
    %179 = arith.addf %175, %178 : vector<8x64xf32>
    %180 = vector.extract_strided_slice %125 {offsets = [104, 0], sizes = [8, 64], strides = [1, 1]} : vector<128x64xbf16> to vector<8x64xbf16>
    %181 = vector.extract_strided_slice %126 {offsets = [832, 0], sizes = [64, 64], strides = [1, 1]} : vector<1024x64xbf16> to vector<64x64xbf16>
    %cst_56 = arith.constant dense<0.000000e+00> : vector<8x64xf32>
    %182 = tpu.matmul %180, %181, %cst_56 {dimension_numbers = #tpu.dot_dimension_numbers<[1], [0], [0], [1], [0, 0, 1, 1], [], []>} : vector<8x64xbf16>, vector<64x64xbf16>, vector<8x64xf32> -> vector<8x64xf32>
    %183 = arith.addf %179, %182 : vector<8x64xf32>
    %184 = vector.extract_strided_slice %125 {offsets = [112, 0], sizes = [8, 64], strides = [1, 1]} : vector<128x64xbf16> to vector<8x64xbf16>
    %185 = vector.extract_strided_slice %126 {offsets = [896, 0], sizes = [64, 64], strides = [1, 1]} : vector<1024x64xbf16> to vector<64x64xbf16>
    %cst_57 = arith.constant dense<0.000000e+00> : vector<8x64xf32>
    %186 = tpu.matmul %184, %185, %cst_57 {dimension_numbers = #tpu.dot_dimension_numbers<[1], [0], [0], [1], [0, 0, 1, 1], [], []>} : vector<8x64xbf16>, vector<64x64xbf16>, vector<8x64xf32> -> vector<8x64xf32>
    %187 = arith.addf %183, %186 : vector<8x64xf32>
    %188 = vector.extract_strided_slice %125 {offsets = [120, 0], sizes = [8, 64], strides = [1, 1]} : vector<128x64xbf16> to vector<8x64xbf16>
    %189 = vector.extract_strided_slice %126 {offsets = [960, 0], sizes = [64, 64], strides = [1, 1]} : vector<1024x64xbf16> to vector<64x64xbf16>
    %cst_58 = arith.constant dense<0.000000e+00> : vector<8x64xf32>
    %190 = tpu.matmul %188, %189, %cst_58 {dimension_numbers = #tpu.dot_dimension_numbers<[1], [0], [0], [1], [0, 0, 1, 1], [], []>} : vector<8x64xbf16>, vector<64x64xbf16>, vector<8x64xf32> -> vector<8x64xf32>
    %191 = arith.addf %187, %190 : vector<8x64xf32>
    %c0_59 = arith.constant 0 : index
    %c0_60 = arith.constant 0 : index
    %192 = vector.load %arg9[%c0_59, %c0_60] : memref<1x64xf32, #tpu.memory_space<vmem>>, vector<1x64xf32>
    %193 = vector.broadcast %192 : vector<1x64xf32> to vector<8x64xf32>
    %194 = arith.addf %191, %193 : vector<8x64xf32>
    %cst_61 = arith.constant 0.000000e+00 : f32
    %195 = vector.broadcast %cst_61 : f32 to vector<8x64xf32>
    %196 = arith.maximumf %194, %195 : vector<8x64xf32>
    %197 = arith.truncf %196 : vector<8x64xf32> to vector<8x64xbf16>
    %c0_62 = arith.constant 0 : index
    %c0_63 = arith.constant 0 : index
    %198 = vector.load %arg10[%c0_62, %c0_63] : memref<64x2xbf16, #tpu.memory_space<vmem>>, vector<64x2xbf16>
    %cst_64 = arith.constant dense<0.000000e+00> : vector<8x2xf32>
    %199 = tpu.matmul %197, %198, %cst_64 {dimension_numbers = #tpu.dot_dimension_numbers<[1], [0], [0], [1], [0, 0, 1, 1], [], []>} : vector<8x64xbf16>, vector<64x2xbf16>, vector<8x2xf32> -> vector<8x2xf32>
    %c0_65 = arith.constant 0 : index
    %c0_66 = arith.constant 0 : index
    %200 = vector.load %arg11[%c0_65, %c0_66] : memref<1x2xf32, #tpu.memory_space<vmem>>, vector<1x2xf32>
    %201 = vector.broadcast %200 : vector<1x2xf32> to vector<8x2xf32>
    %202 = arith.addf %199, %201 : vector<8x2xf32>
    %203 = arith.negf %202 : vector<8x2xf32>
    %204 = math.exp %203 : vector<8x2xf32>
    %cst_67 = arith.constant 1.000000e+00 : f32
    %205 = vector.broadcast %cst_67 : f32 to vector<8x2xf32>
    %206 = arith.addf %205, %204 : vector<8x2xf32>
    %207 = arith.divf %205, %206 : vector<8x2xf32>
    %208 = arith.negf %207 : vector<8x2xf32>
    %209 = math.exp %208 : vector<8x2xf32>
    %cst_68 = arith.constant 1.000000e+00 : f32
    %210 = vector.broadcast %cst_68 : f32 to vector<8x2xf32>
    %211 = arith.addf %210, %209 : vector<8x2xf32>
    %212 = arith.divf %210, %211 : vector<8x2xf32>
    %c0_69 = arith.constant 0 : index
    %c0_70 = arith.constant 0 : index
    %213 = vector.load %arg12[%c0_69, %c0_70] : memref<8x2xf32, #tpu.memory_space<vmem>>, vector<8x2xf32>
    tpu.vector_store %arg12[%c0_69, %c0_70], %212 {strides = array<i32>} : memref<8x2xf32, #tpu.memory_space<vmem>>, vector<8x2xf32>,
    return
  }
  func.func @transform_0(%arg0: i32) -> (i32, i32) {
    %c0_i32 = arith.constant 0 : i32
    %c0_i32_0 = arith.constant 0 : i32
    return %arg0, %c0_i32 : i32, i32
  }
  func.func @transform_1(%arg0: i32) -> (i32, i32) {
    %c0_i32 = arith.constant 0 : i32
    %c0_i32_0 = arith.constant 0 : i32
    %c0_i32_1 = arith.constant 0 : i32
    return %c0_i32, %c0_i32_0 : i32, i32
  }
  func.func @transform_2(%arg0: i32) -> (i32, i32) {
    %c0_i32 = arith.constant 0 : i32
    %c0_i32_0 = arith.constant 0 : i32
    %c0_i32_1 = arith.constant 0 : i32
    return %c0_i32, %c0_i32_0 : i32, i32
  }
  func.func @transform_3(%arg0: i32) -> (i32, i32) {
    %c0_i32 = arith.constant 0 : i32
    %c0_i32_0 = arith.constant 0 : i32
    %c0_i32_1 = arith.constant 0 : i32
    return %c0_i32, %c0_i32_0 : i32, i32
  }
  func.func @transform_4(%arg0: i32) -> (i32, i32) {
    %c0_i32 = arith.constant 0 : i32
    %c0_i32_0 = arith.constant 0 : i32
    %c0_i32_1 = arith.constant 0 : i32
    return %c0_i32, %c0_i32_0 : i32, i32
  }
  func.func @transform_5(%arg0: i32) -> (i32, i32) {
    %c0_i32 = arith.constant 0 : i32
    %c0_i32_0 = arith.constant 0 : i32
    %c0_i32_1 = arith.constant 0 : i32
    return %c0_i32, %c0_i32_0 : i32, i32
  }
  func.func @transform_6(%arg0: i32) -> (i32, i32) {
    %c0_i32 = arith.constant 0 : i32
    %c0_i32_0 = arith.constant 0 : i32
    %c0_i32_1 = arith.constant 0 : i32
    return %c0_i32, %c0_i32_0 : i32, i32
  }
  func.func @transform_7(%arg0: i32) -> (i32, i32) {
    %c0_i32 = arith.constant 0 : i32
    %c0_i32_0 = arith.constant 0 : i32
    %c0_i32_1 = arith.constant 0 : i32
    return %c0_i32, %c0_i32_0 : i32, i32
  }
  func.func @transform_8(%arg0: i32) -> (i32, i32) {
    %c0_i32 = arith.constant 0 : i32
    %c0_i32_0 = arith.constant 0 : i32
    %c0_i32_1 = arith.constant 0 : i32
    return %c0_i32, %c0_i32_0 : i32, i32
  }
  func.func @transform_9(%arg0: i32) -> (i32, i32) {
    %c0_i32 = arith.constant 0 : i32
    %c0_i32_0 = arith.constant 0 : i32
    %c0_i32_1 = arith.constant 0 : i32
    return %c0_i32, %c0_i32_0 : i32, i32
  }
  func.func @transform_10(%arg0: i32) -> (i32, i32) {
    %c0_i32 = arith.constant 0 : i32
    %c0_i32_0 = arith.constant 0 : i32
    %c0_i32_1 = arith.constant 0 : i32
    return %c0_i32, %c0_i32_0 : i32, i32
  }
  func.func @transform_11(%arg0: i32) -> (i32, i32) {
    %c0_i32 = arith.constant 0 : i32
    %c0_i32_0 = arith.constant 0 : i32
    return %arg0, %c0_i32 : i32, i32
  }
}

</mosaic_0001>

<bundles_post_ra>
// kernel: cnn_forward.1
= control target key start
LH: loop header
LB: loop body
LE: loop exit
PB: predicated region body
PF: predicated region fallthrough
CT: control target
= control target key end

     0   :  { %v4130_v0 = vmov 0   ;;  %v131_v19 = vlaneseq  ;;  %vm383_vm0 = vcmask 1043456   ;;  %vm409_vm1 = vcmask 130048   ;;  %s5048_s0 = inlined_call_operand.vmem [shape: f32[128,1], index: 0, kind: input, shape index: {}]   ;;  %s5049_s3 = inlined_call_operand.vmem [shape: bf16[80,32], index: 3, kind: input, shape index: {}]   ;;  %s5050_s1 = inlined_call_operand.vmem [shape: f32[5,16], index: 1, kind: input, shape index: {}]   ;;  %s5051_s2 = inlined_call_operand.vmem [shape: f32[1,16], index: 2, kind: input, shape index: {}]   ;;  %s5052_s5 = inlined_call_operand.vmem [shape: bf16[160,64], index: 5, kind: input, shape index: {}]   ;;  %s5053_s4 = inlined_call_operand.vmem [shape: f32[1,32], index: 4, kind: input, shape index: {}]   ;;  %s5054_s7 = inlined_call_operand.vmem [shape: bf16[1024,64], index: 7, kind: input, shape index: {}]   ;;  %s5055_s6 = inlined_call_operand.vmem [shape: f32[1,64], index: 6, kind: input, shape index: {}]   ;;  %s5056_s9 = inlined_call_operand.vmem [shape: bf16[64,2], index: 9, kind: input, shape index: {}]   ;;  %s5057_s8 = inlined_call_operand.vmem [shape: f32[1,64], index: 8, kind: input, shape index: {}]   ;;  %s5058_s10 = inlined_call_operand.vmem [shape: f32[1,2], index: 10, kind: input, shape index: {}]   ;;  %s5059_s11 = inlined_call_operand.vmem [shape: f32[8,2], index: 11, kind: output, shape index: {}]  }
   0x1   :  { %4038 = vset.pattern.permute.xlu1 %v4130_v0  ;;  %4037 = vset.pattern.permute.xlu0 %v4130_v0  ;;  %v41_v1 = vld [vmem:[%s5048_s0 + $0x10] sm:$0xff]  ;;  %v39_v2 = vld [vmem:[%s5048_s0] sm:$0xff]  ;;  %v42_v3 = vld [vmem:[%s5048_s0 + $0x18] sm:$0xff]  ;;  %vm1124_vm2 = vcmask 261120   ;;  %vm4132_vm3 = vmmov 0   ;;  %vm1960_vm4 = vcmask 523264  }
   0x2   :  { %73 = vperm.xlu1 %4038, %v41_v1   ;;  %63 = vperm.xlu0 %4037, %v39_v2   ;;  %v40_v4 = vld [vmem:[%s5048_s0 + $0x8] sm:$0xff]  ;;  %v43_v6 = vld [vmem:[%s5048_s0 + $0x20] sm:$0xff]  ;;  %v46_v7 = vld [vmem:[%s5048_s0 + $0x38] sm:$0xff]  ;;  %v132_v20 = vshrl.u32 %v131_v19, 7  ;;  %vm3141_vm5 = vcmask 15360  }
   0x3   :  { %v44_v5 = vld [vmem:[%s5048_s0 + $0x28] sm:$0xff]  ;;  %v45_v8 = vld [vmem:[%s5048_s0 + $0x30] sm:$0xff]  ;;  %v47_v10 = vld [vmem:[%s5048_s0 + $0x40] sm:$0xff] }
   0x4   :  { %v48_v9 = vld [vmem:[%s5048_s0 + $0x48] sm:$0xff]  ;;  %v50_v11 = vld [vmem:[%s5048_s0 + $0x58] sm:$0xff]  ;;  %v49_v12 = vld [vmem:[%s5048_s0 + $0x50] sm:$0xff]  ;;  %v133_v21 = vsub.s32 0, %v132_v20  ;;  %v172_v22 = vsub.s32 1, %v132_v20  ;;  %v213_v26 = vsub.s32 2, %v132_v20 }
   0x5   :  { %v52_v13 = vld [vmem:[%s5048_s0 + $0x68] sm:$0xff]  ;;  %v51_v14 = vld [vmem:[%s5048_s0 + $0x60] sm:$0xff]  ;;  %v54_v15 = vld [vmem:[%s5048_s0 + $0x78] sm:$0xff]  ;;  %v249_v27 = vsub.s32 3, %v132_v20  ;;  %v285_v28 = vsub.s32 4, %v132_v20 }
   0x6   :  { %78 = vperm.xlu1 %4038, %v42_v3   ;;  %68 = vperm.xlu0 %4037, %v40_v4   ;;  %v53_v16 = vld [vmem:[%s5048_s0 + $0x70] sm:$0xff]  ;;  %v4039_v17 = vld [vmem:[%s5049_s3 + $0x8] sm:$0xff]   ;;  %v4249_v18 = vld [vmem:[%s5049_s3] sm:$0xff]  }
   0x7   :  { %3510 = vmatprep.subr.bf16.mxu0 %v4039_v17  ;;  %3904 = vmatprep.subr.bf16.mxu1 %v4039_v17  ;;  %v55_v23 = vld [vmem:[%s5050_s1] sm:$0x1f] }
   0x8   :  { %3511 = vmatpush3.bf16.msra.mxu0 %v4039_v17  ;;  %3905 = vmatpush3.bf16.msra.mxu1 %v4039_v17  ;;  %v4255_v24 = vrot.slane %v55_v23, %v133_v21  ;;  %v4257_v25 = vrot.slane %v55_v23, %v172_v22  ;;  %v4259_v29 = vrot.slane %v55_v23, %v213_v26 }
   0x9   :  { %3528 = vmatprep.subr.bf16.mxu0 %v4249_v18  ;;  %v4263_v32 = vrot.slane %v55_v23, %v249_v27  ;;  %v4265_v35 = vrot.slane %v55_v23, %v285_v28 }
   0xa   :  { %88 = vperm.xlu1 %4038, %v44_v5   ;;  %83 = vperm.xlu0 %4037, %v43_v6   ;;  %v135_v30 = vmul.f32 0.0, %v4255_v24  ;;  %v174_v31 = vmul.f32 0.0, %v4257_v25 }
   0xb   :  { %v4270_v39 = vmul.f32 0.0, %v4263_v32  ;;  %v4273_v40 = vmul.f32 0.0, %v4265_v35 }
   0xc   :  { %v190_v36 = vadd.f32 %v174_v31, %v135_v30 }
   0xe   :  { %98 = vperm.xlu1 %4038, %v46_v7   ;;  %93 = vperm.xlu0 %4037, %v45_v8  }
  0x12   :  { %108 = vperm.xlu1 %4038, %v48_v9   ;;  %103 = vperm.xlu0 %4037, %v47_v10  }
  0x16   :  { %118 = vperm.xlu1 %4038, %v50_v11   ;;  %113 = vperm.xlu0 %4037, %v49_v12  }
  0x1a   :  { %128 = vperm.xlu1 %4038, %v52_v13   ;;  %123 = vperm.xlu0 %4037, %v51_v14  }
  0x1e   :  { %208 = vperm.xlu1 %4038, %v54_v15   ;;  %167 = vperm.xlu0 %4037, %v53_v16  }
  0x81   :  { %v74_v33 = vpop.permute.xlu1 %73  ;;  %v64_v34 = vpop.permute.xlu0 %63 }
  0x82   :  { %v175_v37 = vmul.f32 %v4257_v25, %v64_v34  ;;  %v215_v38 = vmul.f32 %v4259_v29, %v64_v34  ;;  %v138_v41 = vmul.f32 %v4255_v24, %v74_v33  ;;  %v177_v42 = vmul.f32 %v4257_v25, %v74_v33 }
  0x83   :  { %v217_v43 = vmul.f32 %v4259_v29, %v74_v33  ;;  %v252_v44 = vmul.f32 %v4263_v32, %v74_v33  ;;  %v287_v47 = vmul.f32 %v4265_v35, %v74_v33  ;;  %v136_v48 = vmul.f32 %v4255_v24, %v64_v34  ;;  %v4311_v33 = vld [vmem:[%s5051_s2] ss:$0 sm:$0xff] }
  0x84   :  { %v191_v49 = vadd.f32 %v175_v37, %v135_v30  ;;  %v231_v51 = vadd.f32 %v215_v38, %v190_v36 }
  0x85   :  { %v79_v45 = vpop.permute.xlu1 %78  ;;  %v69_v46 = vpop.permute.xlu0 %68 }
  0x86   :  { %v178_v50 = vmul.f32 %v4257_v25, %v79_v45  ;;  %v137_v52 = vmul.f32 %v4255_v24, %v69_v46  ;;  %v176_v53 = vmul.f32 %v4257_v25, %v69_v46  ;;  %v216_v54 = vmul.f32 %v4259_v29, %v69_v46 }
  0x87   :  { %v139_v55 = vmul.f32 %v4255_v24, %v79_v45  ;;  %v218_v56 = vmul.f32 %v4259_v29, %v79_v45  ;;  %v253_v57 = vmul.f32 %v4263_v32, %v79_v45  ;;  %v251_v58 = vmul.f32 %v4263_v32, %v69_v46 }
  0x88   :  { %v4290_v59 = vmul.f32 %v4265_v35, %v79_v45  ;;  %v192_v60 = vadd.f32 %v176_v53, %v136_v48  ;;  %v193_v61 = vadd.f32 %v177_v42, %v137_v52  ;;  %v232_v62 = vadd.f32 %v216_v54, %v191_v49 }
  0x89   :  { %v89_v63 = vpop.permute.xlu1 %88  ;;  %v84_v1 = vpop.permute.xlu0 %83  ;;  %v194_v2 = vadd.f32 %v178_v50, %v138_v41  ;;  %v267_v3 = vadd.f32 %v251_v58, %v231_v51 }
  0x8a   :  { %v141_v4 = vmul.f32 %v4255_v24, %v89_v63  ;;  %v180_v5 = vmul.f32 %v4257_v25, %v89_v63  ;;  %v233_v6 = vadd.f32 %v217_v43, %v192_v60  ;;  %v234_v7 = vadd.f32 %v218_v56, %v193_v61 }
  0x8b   :  { %v4294_v8 = vadd.f32 %v252_v44, %v232_v62  ;;  %v220_v9 = vmul.f32 %v4259_v29, %v89_v63  ;;  %v4297_v10 = vadd.f32 %v287_v47, %v267_v3  ;;  %v255_v11 = vmul.f32 %v4263_v32, %v89_v63 }
  0x8c   :  { %v140_v12 = vmul.f32 %v4255_v24, %v84_v1  ;;  %v179_v13 = vmul.f32 %v4257_v25, %v84_v1  ;;  %v269_v14 = vadd.f32 %v253_v57, %v233_v6  ;;  %v219_v15 = vmul.f32 %v4259_v29, %v84_v1 }
  0x8d   :  { %v254_v16 = vmul.f32 %v4263_v32, %v84_v1  ;;  %v289_v17 = vmul.f32 %v4265_v35, %v84_v1  ;;  %v99_v19 = vpop.permute.xlu1 %98  ;;  %v94_v20 = vpop.permute.xlu0 %93  ;;  %v290_v21 = vmul.f32 %v4265_v35, %v89_v63 }
  0x8e   :  { %v195_v22 = vadd.f32 %v179_v13, %v139_v55  ;;  %v196_v23 = vadd.f32 %v180_v5, %v140_v12  ;;  %v143_v26 = vmul.f32 %v4255_v24, %v99_v19  ;;  %v235_v27 = vadd.f32 %v219_v15, %v194_v2 }
  0x8f   :  { %v270_v28 = vadd.f32 %v254_v16, %v234_v7  ;;  %v304_v30 = vadd.f32 %v289_v17, %v269_v14  ;;  %v182_v31 = vmul.f32 %v4257_v25, %v99_v19  ;;  %v222_v34 = vmul.f32 %v4259_v29, %v99_v19 }
  0x90   :  { %v257_v36 = vmul.f32 %v4263_v32, %v99_v19  ;;  %v236_v37 = vadd.f32 %v220_v9, %v195_v22  ;;  %v142_v38 = vmul.f32 %v4255_v24, %v94_v20  ;;  %v271_v43 = vadd.f32 %v255_v11, %v235_v27 }
  0x91   :  { %v305_v41 = vadd.f32 %v290_v21, %v270_v28  ;;  %v327_v42 = vadd.f32 %v4311_v33, %v304_v30  ;;  %v181_v44 = vmul.f32 %v4257_v25, %v94_v20  ;;  %v109_v45 = vpop.permute.xlu1 %108  ;;  %v292_v46 = vmul.f32 %v4265_v35, %v99_v19  ;;  %v104_v58 = vpop.permute.xlu0 %103 }
  0x92   :  { %v221_v47 = vmul.f32 %v4259_v29, %v94_v20  ;;  %v256_v48 = vmul.f32 %v4263_v32, %v94_v20  ;;  %v291_v49 = vmul.f32 %v4265_v35, %v94_v20  ;;  %v198_v53 = vadd.f32 %v182_v31, %v142_v38 }
  0x93   :  { %v328_v50 = vadd.f32 %v4311_v33, %v305_v41  ;;  %v343_v51 = vmax.f32 %v327_v42, 0.0  ;;  %v197_v52 = vadd.f32 %v181_v44, %v141_v4  ;;  %v145_v57 = vmul.f32 %v4255_v24, %v109_v45 }
  0x94   :  { %v237_v54 = vadd.f32 %v221_v47, %v196_v23  ;;  %v272_v55 = vadd.f32 %v256_v48, %v236_v37  ;;  %v306_v56 = vadd.f32 %v291_v49, %v271_v43  ;;  %v184_v61 = vmul.f32 %v4257_v25, %v109_v45 }
  0x95   :  { %v344_v60 = vmax.f32 %v328_v50, 0.0  ;;  %v224_v62 = vmul.f32 %v4259_v29, %v109_v45  ;;  %v259_v63 = vmul.f32 %v4263_v32, %v109_v45  ;;  %v238_v3 = vadd.f32 %v222_v34, %v197_v52  ;;  %v119_v11 = vpop.permute.xlu1 %118  ;;  %v114_v28 = vpop.permute.xlu0 %113 }
  0x96   :  { %v307_v1 = vadd.f32 %v292_v46, %v272_v55  ;;  %v329_v2 = vadd.f32 %v4311_v33, %v306_v56  ;;  %v273_v5 = vadd.f32 %v257_v36, %v237_v54  ;;  %v294_v4 = vmul.f32 %v4265_v35, %v109_v45 }
  0x97   :  { %v144_v6 = vmul.f32 %v4255_v24, %v104_v58  ;;  %v183_v7 = vmul.f32 %v4257_v25, %v104_v58  ;;  %v223_v9 = vmul.f32 %v4259_v29, %v104_v58  ;;  %v4332_v12 = vpack.c.bf16 %v344_v60, %v343_v51 }
  0x98   :  { %v330_v13 = vadd.f32 %v4311_v33, %v307_v1  ;;  %v258_v14 = vmul.f32 %v4263_v32, %v104_v58  ;;  %v293_v15 = vmul.f32 %v4265_v35, %v104_v58  ;;  %v345_v16 = vmax.f32 %v329_v2, 0.0 }
  0x99   :  { %v199_v17 = vadd.f32 %v183_v7, %v143_v26  ;;  %v200_v19 = vadd.f32 %v184_v61, %v144_v6  ;;  %v239_v20 = vadd.f32 %v223_v9, %v198_v53  ;;  %v4338_v27 = vmul.f32 %v4255_v24, %v119_v11  ;;  %v129_v46 = vpop.permute.xlu1 %128  ;;  %v124_v2 = vpop.permute.xlu0 %123 }
  0x9a   :  { %v346_v21 = vmax.f32 %v330_v13, 0.0  ;;  %v274_v22 = vadd.f32 %v258_v14, %v238_v3  ;;  %v308_v23 = vadd.f32 %v293_v15, %v273_v5  ;;  %v186_v30 = vmul.f32 %v4257_v25, %v119_v11 }
  0x9b   :  { %v226_v31 = vmul.f32 %v4259_v29, %v119_v11  ;;  %v261_v34 = vmul.f32 %v4263_v32, %v119_v11  ;;  %v240_v36 = vadd.f32 %v224_v62, %v199_v17  ;;  %v296_v26 = vmul.f32 %v4265_v35, %v119_v11 }
  0x9c   :  { %v309_v37 = vadd.f32 %v294_v4, %v274_v22  ;;  %v331_v38 = vadd.f32 %v4311_v33, %v308_v23  ;;  %v275_v41 = vadd.f32 %v259_v63, %v239_v20  ;;  %v146_v42 = vmul.f32 %v4255_v24, %v114_v28 }
  0x9d   :  { %v185_v43 = vmul.f32 %v4257_v25, %v114_v28  ;;  %v225_v44 = vmul.f32 %v4259_v29, %v114_v28  ;;  %v260_v45 = vmul.f32 %v4263_v32, %v114_v28  ;;  %v4349_v47 = vpack.c.bf16 %v346_v21, %v345_v16  ;;  %v209_v7 = vpop.permute.xlu1 %208 }
  0x9e   :  { %v332_v48 = vadd.f32 %v4311_v33, %v309_v37  ;;  %v295_v49 = vmul.f32 %v4265_v35, %v114_v28  ;;  %v303_v50 = vadd.f32 %v4290_v59, %v4294_v8  ;;  %v347_v51 = vmax.f32 %v331_v38, 0.0 }
  0x9f   :  { %v201_v52 = vadd.f32 %v185_v43, %v145_v57  ;;  %v241_v53 = vadd.f32 %v225_v44, %v200_v19  ;;  %v276_v54 = vadd.f32 %v260_v45, %v240_v36  ;;  %v325_v58 = vadd.f32 %v4311_v33, %v4297_v10  ;;  %v168_v36 = vpop.permute.xlu0 %167 }
  0xa0   :  { %v348_v55 = vmax.f32 %v332_v48, 0.0  ;;  %v310_v56 = vadd.f32 %v295_v49, %v275_v41  ;;  %v326_v60 = vadd.f32 %v4311_v33, %v303_v50  ;;  %v202_v61 = vadd.f32 %v186_v30, %v146_v42  ;;  %v4041_v42 = vld [vmem:[%s5049_s3 + $0x10] sm:$0xff]  }
  0xa1   :  { %v311_v62 = vadd.f32 %v296_v26, %v276_v54  ;;  %v188_v63 = vmul.f32 %v4257_v25, %v129_v46  ;;  %v228_v1 = vmul.f32 %v4259_v29, %v129_v46  ;;  %v341_v8 = vmax.f32 %v325_v58, 0.0 }
  0xa2   :  { %v333_v59 = vadd.f32 %v4311_v33, %v310_v56  ;;  %v342_v57 = vmax.f32 %v326_v60, 0.0  ;;  %v263_v3 = vmul.f32 %v4263_v32, %v129_v46  ;;  %v4362_v5 = vpack.c.bf16 %v348_v55, %v347_v51 }
  0xa3   :  { %v334_v4 = vadd.f32 %v4311_v33, %v311_v62  ;;  %v298_v10 = vmul.f32 %v4265_v35, %v129_v46  ;;  %v242_v6 = vadd.f32 %v226_v31, %v201_v52  ;;  %v385_v13 = vrot.slane %v4332_v12, 4 }
  0xa4   :  { %v349_v9 = vmax.f32 %v333_v59, 0.0  ;;  %v4366_v11 = vpack.c.bf16 %v342_v57, %v341_v8  ;;  %v277_v14 = vadd.f32 %v261_v34, %v241_v53  ;;  %v148_v16 = vmul.f32 %v4255_v24, %v124_v2 }
  0xa5   :  { %v350_v15 = vmax.f32 %v334_v4, 0.0  ;;  %v187_v17 = vmul.f32 %v4257_v25, %v124_v2  ;;  %v262_v19 = vmul.f32 %v4263_v32, %v124_v2  ;;  %v227_v21 = vmul.f32 %v4259_v29, %v124_v2 }
  0xa6   :  { %v384_v20 = vrot.slane %v4366_v11, 4  ;;  %v297_v22 = vmul.f32 %v4265_v35, %v124_v2  ;;  %v230_v23 = vmul.f32 %v4259_v29, %v209_v7  ;;  %v265_v31 = vmul.f32 %v4263_v32, %v209_v7 }
  0xa7   :  { %v4376_v28 = vpack.c.bf16 %v350_v15, %v349_v9  ;;  %v278_v30 = vadd.f32 %v262_v19, %v242_v6  ;;  %v387_v34 = vrot.slane %v4349_v47, 4  ;;  %v149_v41 = vmul.f32 %v4255_v24, %v129_v46 }
  0xa8   :  { %v402_v37 = vsel %vm383_vm0, 0, %v384_v20  ;;  %v4382_v38 = vsel %vm383_vm0, %v384_v20, %v385_v13  ;;  %v312_v26 = vadd.f32 %v297_v22, %v277_v14  ;;  %v203_v45 = vadd.f32 %v187_v17, %v4338_v27 }
  0xa9   :  { %3512 = vmatprep.mubr.msk.bf16.mxu0 %vm409_vm1, %v402_v37  ;;  %v313_v43 = vadd.f32 %v298_v10, %v278_v30  ;;  %v4390_v44 = vsel %vm383_vm0, %v385_v13, %v387_v34  ;;  %v204_v48 = vadd.f32 %v188_v63, %v148_v16  ;;  %v243_v50 = vadd.f32 %v227_v21, %v202_v61 }
  0xaa   :  { %3513 = vmatmul.mubr.msk.bf16.vlgmr.msra.gmra.mrb[0].mxu0 %vm409_vm1, %v4382_v38  ;;  %v335_v49 = vadd.f32 %v4311_v33, %v312_v26  ;;  %v189_v24 = vmul.f32 %v4257_v25, %v168_v36  ;;  %v229_v46 = vmul.f32 %v4259_v29, %v168_v36  ;;  %v244_v52 = vadd.f32 %v228_v1, %v203_v45 }
  0xab   :  { %3529 = vmatpush3.bf16.msra.mxu0 %v4249_v18  ;;  %v336_v51 = vadd.f32 %v4311_v33, %v313_v43  ;;  %3516 = vmatprep.mubr.msk.bf16.mxu0 %vm409_vm1, %v4390_v44  ;;  %v264_v27 = vmul.f32 %v4263_v32, %v168_v36  ;;  %v389_v53 = vrot.slane %v4362_v5, 4  ;;  %v300_v54 = vmul.f32 %v4265_v35, %v209_v7 }
  0xac   :  { %v279_v55 = vadd.f32 %v263_v3, %v243_v50  ;;  %v205_v56 = vadd.f32 %v189_v24, %v149_v41  ;;  %v245_v58 = vadd.f32 %v229_v46, %v204_v48  ;;  %3546 = vmatprep.subr.bf16.mxu0 %v4041_v42  ;;  %v351_v25 = vmax.f32 %v335_v49, 0.0 }
  0xad   :  { %v352_v29 = vmax.f32 %v336_v51, 0.0  ;;  %v280_v60 = vadd.f32 %v264_v27, %v244_v52  ;;  %v299_v18 = vmul.f32 %v4265_v35, %v168_v36  ;;  %v391_v63 = vrot.slane %v4376_v28, 4  ;;  %v4505_v36 = vld [vmem:[%s5053_s4] ss:$0 sm:$0xff] }
  0xae   :  { %v246_v61 = vadd.f32 %v230_v23, %v205_v56  ;;  %v281_v62 = vadd.f32 %v265_v31, %v245_v58  ;;  %v390_v59 = vsel %vm383_vm0, %v387_v34, %v389_v53  ;;  %v4043_v23 = vld [vmem:[%s5049_s3 + $0x20] sm:$0xff]  }
  0xaf   :  { %v4407_v1 = vpack.c.bf16 %v352_v29, %v351_v25  ;;  %v314_v32 = vadd.f32 %v299_v18, %v279_v55  ;;  %v315_v2 = vadd.f32 %v300_v54, %v280_v60  ;;  %v392_v3 = vsel %vm383_vm0, %v389_v53, %v391_v63 }
  0xb0   :  { %v282_v8 = vadd.f32 %v4270_v39, %v246_v61  ;;  %v316_v57 = vadd.f32 %v4273_v40, %v281_v62  ;;  %v4047_v62 = vld [vmem:[%s5052_s5 + $0x8] sm:$0xff]  }
  0xb1   :  { %v337_v4 = vadd.f32 %v4311_v33, %v314_v32  ;;  %v338_v35 = vadd.f32 %v4311_v33, %v315_v2  ;;  %v393_v39 = vrot.slane %v4407_v1, 4 }
  0xb2   :  { %v317_v10 = vadd.f32 %v4273_v40, %v282_v8  ;;  %v339_v6 = vadd.f32 %v4311_v33, %v316_v57  ;;  %3517 = vmatmul.mubr.msk.bf16.gmra.mrb[4].mxu0 %vm409_vm1, %v390_v59 }
  0xb3   :  { %v353_v7 = vmax.f32 %v337_v4, 0.0  ;;  %v354_v9 = vmax.f32 %v338_v35, 0.0  ;;  %3520 = vmatprep.mubr.msk.bf16.mxu0 %vm409_vm1, %v392_v3  ;;  %v394_v17 = vsel %vm383_vm0, %v391_v63, %v393_v39 }
  0xb4   :  { %v340_v13 = vadd.f32 %v4311_v33, %v317_v10  ;;  %v355_v15 = vmax.f32 %v339_v6, 0.0  ;;  %v4042_v33 = vld [vmem:[%s5049_s3 + $0x18] sm:$0xff]  }
  0xb5   :  { %v363_v14 = vpack.c.bf16 %v354_v9, %v353_v7 }
  0xb6   :  { %v356_v16 = vmax.f32 %v340_v13, 0.0 }
  0xb7   :  { %v395_v19 = vrot.slane %v363_v14, 4 }
  0xb8   :  { %v364_v20 = vpack.c.bf16 %v356_v16, %v355_v15 }
  0xb9   :  { %v396_v40 = vsel %vm383_vm0, %v393_v39, %v395_v19 }
  0xba   :  { %3521 = vmatmul.mubr.msk.bf16.gmra.mrb[8].mxu0 %vm409_vm1, %v394_v17  ;;  %3524 = vmatprep.mubr.msk.bf16.mxu1 %vm409_vm1, %v396_v40  ;;  %v397_v21 = vrot.slane %v364_v20, 4 }
  0xbb   :  { %3530 = vmatprep.mubr.bf16.mxu0 %v4130_v0 }
  0xbc   :  { %v398_v22 = vsel %vm383_vm0, %v395_v19, %v397_v21 }
  0xbd   :  { %3525 = vmatmul.mubr.msk.bf16.vlgmr.msra.gmra.mrb[0].mxu1 %vm409_vm1, %v398_v22 }
  0xc2   :  { %3531 = vmatmul.mubr.msk.bf16.vlgmr.msra.gmra.mrb[0].mxu0 %vm409_vm1, %v4366_v11 }
  0xc3   :  { %3547 = vmatpush3.bf16.msra.mxu0 %v4041_v42  ;;  %3534 = vmatprep.mubr.msk.bf16.mxu0 %vm409_vm1, %v4332_v12 }
  0xc4   :  { %3564 = vmatprep.subr.bf16.mxu0 %v4042_v33 }
  0xca   :  { %3535 = vmatmul.mubr.msk.bf16.gmra.mrb[4].mxu0 %vm409_vm1, %v4349_v47 }
  0xcb   :  { %3538 = vmatprep.mubr.msk.bf16.mxu0 %vm409_vm1, %v4362_v5 }
  0xd2   :  { %3539 = vmatmul.mubr.msk.bf16.gmra.mrb[8].mxu0 %vm409_vm1, %v4376_v28 }
  0xd3   :  { %3542 = vmatprep.mubr.msk.bf16.mxu0 %vm409_vm1, %v4407_v1 }
  0xda   :  { %3543 = vmatmul.mubr.msk.bf16.gmra.mrb[12].mxu0 %vm409_vm1, %v363_v14 }
  0xdb   :  { %3548 = vmatprep.mubr.msk.bf16.mxu0 %vm409_vm1, %v4366_v11  ;;  %v779_v11 = vsel %vm383_vm0, %v397_v21, 0 }
  0xe2   :  { %3549 = vmatmul.mubr.msk.bf16.vlgmr.msra.gmra.mrb[0].mxu0 %vm409_vm1, %v4332_v12 }
  0xe3   :  { %3565 = vmatpush3.bf16.msra.mxu0 %v4042_v33  ;;  %3552 = vmatprep.mubr.msk.bf16.mxu0 %vm409_vm1, %v4349_v47 }
  0xe4   :  { %3582 = vmatprep.subr.bf16.mxu0 %v4043_v23 }
  0xea   :  { %3553 = vmatmul.mubr.msk.bf16.gmra.mrb[4].mxu0 %vm409_vm1, %v4362_v5 }
  0xeb   :  { %3556 = vmatprep.mubr.msk.bf16.mxu0 %vm409_vm1, %v4376_v28 }
  0xf2   :  { %3557 = vmatmul.mubr.msk.bf16.gmra.mrb[8].mxu0 %vm409_vm1, %v4407_v1 }
  0xf3   :  { %3560 = vmatprep.mubr.msk.bf16.mxu0 %vm409_vm1, %v363_v14 }
  0xfa   :  { %3561 = vmatmul.mubr.msk.bf16.gmra.mrb[12].mxu0 %vm409_vm1, %v364_v20 }
  0xfb   :  { %3566 = vmatprep.mubr.msk.bf16.mxu0 %vm409_vm1, %v4382_v38 }
 0x102   :  { %3567 = vmatmul.mubr.msk.bf16.vlgmr.msra.gmra.mrb[0].mxu0 %vm409_vm1, %v4390_v44 }
 0x103   :  { %3583 = vmatpush3.bf16.msra.mxu0 %v4043_v23  ;;  %3570 = vmatprep.mubr.msk.bf16.mxu0 %vm409_vm1, %v390_v59 }
 0x10a   :  { %3571 = vmatmul.mubr.msk.bf16.gmra.mrb[4].mxu0 %vm409_vm1, %v392_v3  ;;  %v4538_v3 = vld [vmem:[%s5052_s5 + $0x20] sm:$0xff]  }
 0x10b   :  { %3574 = vmatprep.mubr.msk.bf16.mxu0 %vm409_vm1, %v394_v17 }
 0x112   :  { %3575 = vmatmul.mubr.msk.bf16.gmra.mrb[8].mxu0 %vm409_vm1, %v396_v40 }
 0x113   :  { %3578 = vmatprep.mubr.msk.bf16.mxu0 %vm409_vm1, %v398_v22 }
 0x11a   :  { %3579 = vmatmul.mubr.msk.bf16.gmra.mrb[12].mxu0 %vm409_vm1, %v779_v11 }
 0x11b   :  { %3584 = vmatprep.mubr.msk.bf16.mxu0 %vm409_vm1, %v4332_v12  ;;  %v4044_v12 = vld [vmem:[%s5052_s5 + $0x10] sm:$0xff]  }
 0x11c   :  { %3600 = vmatprep.subr.bf16.mxu1 %v4044_v12 }
 0x11d   :  { %3601 = vmatpush3.bf16.msra.mxu1 %v4044_v12 }
 0x122   :  { %3585 = vmatmul.mubr.msk.bf16.vlgmr.msra.gmra.mrb[0].mxu0 %vm409_vm1, %v4349_v47  ;;  %v4045_v47 = vld [vmem:[%s5052_s5 + $0x18] sm:$0xff]  }
 0x123   :  { %3588 = vmatprep.mubr.msk.bf16.mxu0 %vm409_vm1, %v4362_v5  ;;  %3602 = vmatprep.subr.bf16.mxu1 %v4045_v47  ;;  %v4046_v5 = vld [vmem:[%s5052_s5] sm:$0xff]  }
 0x124   :  { %3603 = vmatpush3.bf16.msra.mxu1 %v4045_v47 }
 0x125   :  { %3620 = vmatprep.subr.bf16.mxu1 %v4046_v5 }
 0x12a   :  { %3589 = vmatmul.mubr.msk.bf16.gmra.mrb[4].mxu0 %vm409_vm1, %v4376_v28 }
 0x12b   :  { %3592 = vmatprep.mubr.msk.bf16.mxu0 %vm409_vm1, %v4407_v1 }
 0x132   :  { %3593 = vmatmul.mubr.msk.bf16.gmra.mrb[8].mxu0 %vm409_vm1, %v363_v14 }
 0x133   :  { %3596 = vmatprep.mubr.msk.bf16.mxu0 %vm409_vm1, %v364_v20 }
 0x13a   :  { %3597 = vmatmul.mubr.bf16.gmra.mrb[12].mxu0 %v4130_v0 }
 0x190   :  { %v4494_v28 = vpop.f32.mrb[0].mxu1 }
 0x191   :  { %v4496_v30 = vpop.f32.mrb[1].mxu1 }
 0x192   :  { %v4498_v31 = vpop.f32.mrb[2].mxu1 }
 0x193   :  { %v4500_v34 = vpop.f32.mrb[3].mxu1 }
 0x1f5   :  { %v3586_v37 = vpop.f32.mrb[0].mxu0 }
 0x1f6   :  { %v1029_v38 = vadd.f32 %v3586_v37, %v4505_v36  ;;  %v941_v26 = vpop.f32.mrb[1].mxu0 }
 0x1f7   :  { %v1027_v41 = vadd.f32 %v4505_v36, %v941_v26  ;;  %v3587_v42 = vpop.f32.mrb[2].mxu0 }
 0x1f8   :  { %v1030_v43 = vadd.f32 %v3587_v42, %v4505_v36  ;;  %v944_v44 = vpop.f32.mrb[3].mxu0  ;;  %v1045_v48 = vmax.f32 %v1029_v38, 0.0 }
 0x1f9   :  { %v1028_v45 = vadd.f32 %v4505_v36, %v944_v44  ;;  %v1043_v50 = vmax.f32 %v1027_v41, 0.0 }
 0x1fa   :  { %v1046_v49 = vmax.f32 %v1030_v43, 0.0 }
 0x1fb   :  { %v1044_v24 = vmax.f32 %v1028_v45, 0.0 }
 0x1fc   :  { %v4511_v46 = vpack.c.bf16 %v1046_v49, %v1045_v48 }
 0x1fd   :  { %v4513_v51 = vpack.c.bf16 %v1044_v24, %v1043_v50  ;;  %v3590_v52 = vpop.f32.mrb[4].mxu0 }
 0x1fe   :  { %v1033_v27 = vadd.f32 %v3590_v52, %v4505_v36  ;;  %v957_v53 = vpop.f32.mrb[5].mxu0  ;;  %v1096_v54 = vrot.slane %v4511_v46, 4 }
 0x1ff   :  { %v1031_v55 = vadd.f32 %v4505_v36, %v957_v53  ;;  %v3591_v56 = vpop.f32.mrb[6].mxu0  ;;  %v1095_v58 = vrot.slane %v4513_v51, 4 }
 0x200   :  { %v1034_v25 = vadd.f32 %v3591_v56, %v4505_v36  ;;  %v960_v29 = vpop.f32.mrb[7].mxu0  ;;  %v1049_v63 = vmax.f32 %v1033_v27, 0.0  ;;  %v4056_v56 = vld [vmem:[%s5054_s7 + $0x28] sm:$0xff]  }
 0x201   :  { %v1032_v60 = vadd.f32 %v4505_v36, %v960_v29  ;;  %v1111_v18 = vsel %vm383_vm0, 0, %v1095_v58  ;;  %v4523_v61 = vsel %vm383_vm0, %v1095_v58, %v1096_v54  ;;  %v1047_v32 = vmax.f32 %v1031_v55, 0.0  ;;  %v4054_v55 = vld [vmem:[%s5054_s7 + $0x20] sm:$0xff]   ;;  %v4049_v58 = vld [vmem:[%s5052_s5 + $0x28] sm:$0xff]   ;;  %v4050_v29 = vld [vmem:[%s5052_s5 + $0x30] sm:$0xff]  }
 0x202   :  { %v1050_v1 = vmax.f32 %v1034_v25, 0.0  ;;  %3604 = vmatprep.mubr.msk.bf16.mxu1 %vm1124_vm2, %v1111_v18  ;;  %v4058_v25 = vld [vmem:[%s5054_s7 + $0x30] sm:$0xff]   ;;  %v4052_v18 = vld [vmem:[%s5052_s5 + $0x40] sm:$0xff]  }
 0x203   :  { %v1048_v2 = vmax.f32 %v1032_v60, 0.0  ;;  %3605 = vmatmul.mubr.msk.bf16.vlgmr.msra.gmra.mrb[4].mxu1 %vm1124_vm2, %v4523_v61  ;;  %v4051_v60 = vld [vmem:[%s5052_s5 + $0x38] sm:$0xff]  }
 0x204   :  { %v4531_v59 = vpack.c.bf16 %v1050_v1, %v1049_v63  ;;  %3621 = vmatpush3.bf16.msra.mxu1 %v4046_v5  ;;  %v4057_v63 = vld [vmem:[%s5054_s7 + $0x8] sm:$0xff]   ;;  %v4061_v1 = vld [vmem:[%s5054_s7 + $0x18] sm:$0xff]  }
 0x205   :  { %v4533_v8 = vpack.c.bf16 %v1048_v2, %v1047_v32  ;;  %v3594_v57 = vpop.f32.mrb[8].mxu0  ;;  %3622 = vmatprep.subr.bf16.mxu1 %v4047_v62  ;;  %v4060_v32 = vld [vmem:[%s5054_s7 + $0x38] sm:$0xff]  }
 0x206   :  { %v1037_v4 = vadd.f32 %v3594_v57, %v4505_v36  ;;  %v973_v35 = vpop.f32.mrb[9].mxu0  ;;  %v1100_v10 = vrot.slane %v4531_v59, 4 }
 0x207   :  { %v1035_v6 = vadd.f32 %v4505_v36, %v973_v35  ;;  %v3595_v7 = vpop.f32.mrb[10].mxu0  ;;  %v1098_v9 = vrot.slane %v4533_v8, 4 }
 0x208   :  { %v1038_v39 = vadd.f32 %v3595_v7, %v4505_v36  ;;  %v976_v13 = vpop.f32.mrb[11].mxu0  ;;  %3623 = vmatpush3.bf16.msra.mxu1 %v4047_v62  ;;  %v1053_v17 = vmax.f32 %v1037_v4, 0.0  ;;  %v4055_v62 = vld [vmem:[%s5054_s7] sm:$0xff]  }
 0x209   :  { %v1036_v14 = vadd.f32 %v4505_v36, %v976_v13  ;;  %v4547_v15 = vsel %vm383_vm0, %v1096_v54, %v1098_v9  ;;  %v4550_v16 = vsel %vm383_vm0, %v1098_v9, %v1100_v10  ;;  %3640 = vmatprep.subr.bf16.mxu1 %v4538_v3  ;;  %v1051_v20 = vmax.f32 %v1035_v6, 0.0 }
 0x20a   :  { %v1054_v19 = vmax.f32 %v1038_v39, 0.0  ;;  %3608 = vmatprep.mubr.msk.bf16.mxu1 %vm1124_vm2, %v4547_v15 }
 0x20b   :  { %v1052_v40 = vmax.f32 %v1036_v14, 0.0  ;;  %3609 = vmatmul.mubr.msk.bf16.gmra.mrb[8].mxu1 %vm1124_vm2, %v4550_v16  ;;  %v4062_v14 = vld [vmem:[%s5054_s7 + $0x60] sm:$0xff]  }
 0x20c   :  { %v4557_v21 = vpack.c.bf16 %v1054_v19, %v1053_v17 }
 0x20d   :  { %v4559_v22 = vpack.c.bf16 %v1052_v40, %v1051_v20  ;;  %v3598_v33 = vpop.f32.mrb[12].mxu0  ;;  %v4063_v20 = vld [vmem:[%s5054_s7 + $0x40] sm:$0xff]  }
 0x20e   :  { %v3906_v23 = vadd.f32 %v3598_v33, %v4494_v28  ;;  %v989_v11 = vpop.f32.mrb[13].mxu0  ;;  %v1104_v12 = vrot.slane %v4557_v21, 4 }
 0x20f   :  { %v3907_v47 = vadd.f32 %v989_v11, %v4496_v30  ;;  %v3599_v5 = vpop.f32.mrb[14].mxu0  ;;  %v1102_v37 = vrot.slane %v4559_v22, 4  ;;  %v4064_v11 = vld [vmem:[%s5054_s7 + $0x68] sm:$0xff]  }
 0x210   :  { %v1041_v38 = vadd.f32 %v3906_v23, %v4505_v36  ;;  %v3908_v26 = vadd.f32 %v3599_v5, %v4498_v31  ;;  %v992_v41 = vpop.f32.mrb[15].mxu0 }
 0x211   :  { %v1039_v42 = vadd.f32 %v3907_v47, %v4505_v36  ;;  %v3909_v43 = vadd.f32 %v992_v41, %v4500_v34  ;;  %v4570_v44 = vsel %vm383_vm0, %v1100_v10, %v1102_v37  ;;  %v4573_v28 = vsel %vm383_vm0, %v1102_v37, %v1104_v12  ;;  %v4065_v37 = vld [vmem:[%s5054_s7 + $0x48] sm:$0xff]  }
 0x212   :  { %v1042_v30 = vadd.f32 %v3908_v26, %v4505_v36  ;;  %3612 = vmatprep.mubr.msk.bf16.mxu1 %vm1124_vm2, %v4570_v44  ;;  %v1057_v31 = vmax.f32 %v1041_v38, 0.0 }
 0x213   :  { %v1040_v45 = vadd.f32 %v3909_v43, %v4505_v36  ;;  %3613 = vmatmul.mubr.msk.bf16.gmra.mrb[12].mxu1 %vm1124_vm2, %v4573_v28  ;;  %v1055_v49 = vmax.f32 %v1039_v42, 0.0  ;;  %v4131_v36 = vmov 0.0   ;;  %v4066_v42 = vld [vmem:[%s5054_s7 + $0x70] sm:$0xff]  }
 0x214   :  { %v1058_v48 = vmax.f32 %v1042_v30, 0.0  ;;  %3700 = vmatprep.subr.bf16.mxu0 %v4131_v36  ;;  %3708 = vmatprep.mubr.msk.bf16.mxu0 %vm4132_vm3, %v4131_v36 }
 0x215   :  { %v1056_v34 = vmax.f32 %v1040_v45, 0.0  ;;  %3701 = vmatpush3.bf16.msra.mxu0 %v4054_v55  ;;  %v4067_v45 = vld [vmem:[%s5054_s7 + $0x50] sm:$0xff]  }
 0x216   :  { %v4581_v50 = vpack.c.bf16 %v1058_v48, %v1057_v31  ;;  %3702 = vmatprep.subr.bf16.mxu0 %v4131_v36 }
 0x217   :  { %v4583_v24 = vpack.c.bf16 %v1056_v34, %v1055_v49 }
 0x218   :  { %v1108_v52 = vrot.slane %v4581_v50, 4 }
 0x219   :  { %v1106_v27 = vrot.slane %v4583_v24, 4  ;;  %3703 = vmatpush3.bf16.msra.mxu0 %v4056_v56 }
 0x21a   :  { %3704 = vmatprep.subr.bf16.mxu0 %v4131_v36 }
 0x21b   :  { %v1107_v53 = vsel %vm383_vm0, %v1104_v12, %v1106_v27  ;;  %v1109_v54 = vsel %vm383_vm0, %v1106_v27, %v1108_v52 }
 0x21c   :  { %3616 = vmatprep.mubr.msk.bf16.mxu1 %vm1124_vm2, %v1107_v53 }
 0x21d   :  { %3617 = vmatmul.mubr.msk.bf16.gmra.mrb[16].mxu1 %vm1124_vm2, %v1109_v54  ;;  %3705 = vmatpush3.bf16.msra.mxu0 %v4058_v25 }
 0x21e   :  { %3624 = vmatprep.mubr.bf16.mxu1 %v4130_v0  ;;  %3706 = vmatprep.subr.bf16.mxu0 %v4131_v36 }
 0x221   :  { %3707 = vmatpush3.bf16.msra.mxu0 %v4060_v32  ;;  %v4072_v32 = vld [vmem:[%s5054_s7 + $0xa8] sm:$0xff]  }
 0x222   :  { %3724 = vmatprep.subr.bf16.mxu0 %v4131_v36 }
 0x225   :  { %3625 = vmatmul.mubr.msk.bf16.vlgmr.msra.gmra.mrb[4].mxu1 %vm1124_vm2, %v4513_v51 }
 0x226   :  { %3641 = vmatpush3.bf16.msra.mxu1 %v4538_v3  ;;  %3628 = vmatprep.mubr.msk.bf16.mxu1 %vm1124_vm2, %v4511_v46 }
 0x227   :  { %3642 = vmatprep.subr.bf16.mxu1 %v4049_v58 }
 0x22a   :  { %3643 = vmatpush3.bf16.msra.mxu1 %v4049_v58  ;;  %v4070_v58 = vld [vmem:[%s5054_s7 + $0xa0] sm:$0xff]  }
 0x22b   :  { %3660 = vmatprep.subr.bf16.mxu1 %v4050_v29 }
 0x22d   :  { %3629 = vmatmul.mubr.msk.bf16.gmra.mrb[8].mxu1 %vm1124_vm2, %v4533_v8 }
 0x22e   :  { %3632 = vmatprep.mubr.msk.bf16.mxu1 %vm1124_vm2, %v4531_v59 }
 0x235   :  { %3633 = vmatmul.mubr.msk.bf16.gmra.mrb[12].mxu1 %vm1124_vm2, %v4559_v22 }
 0x236   :  { %3636 = vmatprep.mubr.msk.bf16.mxu1 %vm1124_vm2, %v4557_v21 }
 0x23d   :  { %3637 = vmatmul.mubr.msk.bf16.gmra.mrb[16].mxu1 %vm1124_vm2, %v4583_v24 }
 0x23e   :  { %3644 = vmatprep.mubr.msk.bf16.mxu1 %vm1124_vm2, %v4513_v51  ;;  %v4053_v51 = vld [vmem:[%s5052_s5 + $0x48] sm:$0xff]  }
 0x245   :  { %3645 = vmatmul.mubr.msk.bf16.vlgmr.msra.gmra.mrb[4].mxu1 %vm1124_vm2, %v4511_v46 }
 0x246   :  { %3661 = vmatpush3.bf16.msra.mxu1 %v4050_v29  ;;  %3648 = vmatprep.mubr.msk.bf16.mxu1 %vm1124_vm2, %v4533_v8 }
 0x247   :  { %3662 = vmatprep.subr.bf16.mxu1 %v4051_v60 }
 0x24a   :  { %3663 = vmatpush3.bf16.msra.mxu1 %v4051_v60 }
 0x24b   :  { %3680 = vmatprep.subr.bf16.mxu1 %v4052_v18 }
 0x24d   :  { %3649 = vmatmul.mubr.msk.bf16.gmra.mrb[8].mxu1 %vm1124_vm2, %v4531_v59 }
 0x24e   :  { %3652 = vmatprep.mubr.msk.bf16.mxu1 %vm1124_vm2, %v4559_v22 }
 0x255   :  { %3653 = vmatmul.mubr.msk.bf16.gmra.mrb[12].mxu1 %vm1124_vm2, %v4557_v21 }
 0x256   :  { %3656 = vmatprep.mubr.msk.bf16.mxu1 %vm1124_vm2, %v4583_v24 }
 0x25d   :  { %3657 = vmatmul.mubr.msk.bf16.gmra.mrb[16].mxu1 %vm1124_vm2, %v4581_v50 }
 0x25e   :  { %3664 = vmatprep.mubr.msk.bf16.mxu1 %vm1124_vm2, %v4523_v61  ;;  %v1506_v61 = vsel %vm383_vm0, %v1108_v52, 0 }
 0x265   :  { %3665 = vmatmul.mubr.msk.bf16.vlgmr.msra.gmra.mrb[4].mxu1 %vm1124_vm2, %v4547_v15 }
 0x266   :  { %3681 = vmatpush3.bf16.msra.mxu1 %v4052_v18  ;;  %3668 = vmatprep.mubr.msk.bf16.mxu1 %vm1124_vm2, %v4550_v16 }
 0x267   :  { %3682 = vmatprep.subr.bf16.mxu1 %v4053_v51 }
 0x26a   :  { %3683 = vmatpush3.bf16.msra.mxu1 %v4053_v51 }
 0x26b   :  { %3712 = vmatprep.subr.bf16.mxu1 %v4131_v36 }
 0x26d   :  { %3669 = vmatmul.mubr.msk.bf16.gmra.mrb[8].mxu1 %vm1124_vm2, %v4570_v44 }
 0x26e   :  { %3672 = vmatprep.mubr.msk.bf16.mxu1 %vm1124_vm2, %v4573_v28 }
 0x275   :  { %3673 = vmatmul.mubr.msk.bf16.gmra.mrb[12].mxu1 %vm1124_vm2, %v1107_v53  ;;  %v4069_v53 = vld [vmem:[%s5054_s7 + $0x58] sm:$0xff]  }
 0x276   :  { %3676 = vmatprep.mubr.msk.bf16.mxu1 %vm1124_vm2, %v1109_v54 }
 0x27d   :  { %3677 = vmatmul.mubr.msk.bf16.gmra.mrb[16].mxu1 %vm1124_vm2, %v1506_v61  ;;  %v4071_v61 = vld [vmem:[%s5054_s7 + $0x80] sm:$0xff]  }
 0x27e   :  { %3684 = vmatprep.mubr.msk.bf16.mxu1 %vm1124_vm2, %v4511_v46  ;;  %v4059_v46 = vld [vmem:[%s5054_s7 + $0x10] sm:$0xff]  }
 0x285   :  { %3685 = vmatmul.mubr.msk.bf16.vlgmr.msra.gmra.mrb[4].mxu1 %vm1124_vm2, %v4533_v8 }
 0x286   :  { %3688 = vmatprep.mubr.msk.bf16.mxu1 %vm1124_vm2, %v4531_v59  ;;  %3713 = vmatpush3.bf16.msra.mxu1 %v4055_v62 }
 0x287   :  { %3714 = vmatprep.subr.bf16.mxu1 %v4131_v36 }
 0x28a   :  { %3715 = vmatpush3.bf16.msra.mxu1 %v4057_v63 }
 0x28b   :  { %3716 = vmatprep.subr.bf16.mxu1 %v4131_v36 }
 0x28d   :  { %3689 = vmatmul.mubr.msk.bf16.gmra.mrb[8].mxu1 %vm1124_vm2, %v4559_v22 }
 0x28e   :  { %3692 = vmatprep.mubr.msk.bf16.mxu1 %vm1124_vm2, %v4557_v21  ;;  %3717 = vmatpush3.bf16.msra.mxu1 %v4059_v46 }
 0x28f   :  { %3718 = vmatprep.subr.bf16.mxu1 %v4131_v36 }
 0x292   :  { %3719 = vmatpush3.bf16.msra.mxu1 %v4061_v1 }
 0x293   :  { %3736 = vmatprep.subr.bf16.mxu1 %v4131_v36 }
 0x295   :  { %3693 = vmatmul.mubr.msk.bf16.gmra.mrb[12].mxu1 %vm1124_vm2, %v4583_v24 }
 0x296   :  { %3696 = vmatprep.mubr.msk.bf16.mxu1 %vm1124_vm2, %v4581_v50  ;;  %v4068_v50 = vld [vmem:[%s5054_s7 + $0x78] sm:$0xff]  }
 0x29d   :  { %3697 = vmatmul.mubr.bf16.gmra.mrb[16].mxu1 %v4130_v0  ;;  %v4708_v0 = vld [vmem:[%s5055_s6] ss:$0 sm:$0xff] }
 0x29e   :  { %3720 = vmatprep.mubr.msk.bf16.mxu1 %vm4132_vm3, %v4131_v36 }
 0x358   :  { %v3686_v2 = vpop.f32.mrb[4].mxu1 }
 0x359   :  { %v1768_v59 = vadd.f32 %v3686_v2, %v4708_v0  ;;  %v1680_v8 = vpop.f32.mrb[5].mxu1 }
 0x35a   :  { %v1766_v57 = vadd.f32 %v4708_v0, %v1680_v8  ;;  %v3687_v3 = vpop.f32.mrb[6].mxu1 }
 0x35b   :  { %v1769_v4 = vadd.f32 %v3687_v3, %v4708_v0  ;;  %v1683_v35 = vpop.f32.mrb[7].mxu1  ;;  %v1784_v6 = vmax.f32 %v1768_v59, 0.0 }
 0x35c   :  { %v1767_v10 = vadd.f32 %v4708_v0, %v1683_v35  ;;  %v1782_v9 = vmax.f32 %v1766_v57, 0.0  ;;  %v4073_v57 = vld [vmem:[%s5054_s7 + $0x88] sm:$0xff]   ;;  %v4074_v35 = vld [vmem:[%s5054_s7 + $0xb0] sm:$0xff]  }
 0x35d   :  { %v1785_v7 = vmax.f32 %v1769_v4, 0.0 }
 0x35e   :  { %v1783_v39 = vmax.f32 %v1767_v10, 0.0 }
 0x35f   :  { %v4714_v13 = vpack.c.bf16 %v1785_v7, %v1784_v6  ;;  %v4075_v6 = vld [vmem:[%s5054_s7 + $0x90] sm:$0xff]   ;;  %v4076_v7 = vld [vmem:[%s5054_s7 + $0xb8] sm:$0xff]  }
 0x360   :  { %v1798_v15 = vpack.c.bf16 %v1783_v39, %v1782_v9  ;;  %v3690_v16 = vpop.f32.mrb[8].mxu1  ;;  %v4077_v9 = vld [vmem:[%s5054_s7 + $0x98] sm:$0xff]   ;;  %v4078_v39 = vld [vmem:[%s5054_s7 + $0xe0] sm:$0xff]  }
 0x361   :  { %v1772_v17 = vadd.f32 %v3690_v16, %v4708_v0  ;;  %v1696_v19 = vpop.f32.mrb[9].mxu1  ;;  %v2140_v25 = vrot.slane %v4714_v13, 4  ;;  %v4081_v16 = vld [vmem:[%s5054_s7 + $0xc8] sm:$0xff]  }
 0x362   :  { %v1935_v40 = vrot.slane %v1798_v15, 4  ;;  %v1770_v21 = vadd.f32 %v4708_v0, %v1696_v19  ;;  %v3691_v22 = vpop.f32.mrb[10].mxu1  ;;  %3721 = vmatmul.mubr.msk.bf16.vlgmr.msra.gmra.mrb[20].mxu1 %vm1960_vm4, %v1798_v15  ;;  %v4080_v15 = vld [vmem:[%s5054_s7 + $0xe8] sm:$0xff]   ;;  %v4083_v19 = vld [vmem:[%s5054_s7 + $0xd0] sm:$0xff]  }
 0x363   :  { %v1773_v33 = vadd.f32 %v3691_v22, %v4708_v0  ;;  %3737 = vmatpush3.bf16.msra.mxu1 %v4062_v14  ;;  %v1699_v23 = vpop.f32.mrb[11].mxu1  ;;  %3744 = vmatprep.mubr.msk.bf16.mxu1 %vm4132_vm3, %v4131_v36  ;;  %v1788_v47 = vmax.f32 %v1772_v17, 0.0  ;;  %v4079_v14 = vld [vmem:[%s5054_s7 + $0xc0] sm:$0xff]   ;;  %v4082_v17 = vld [vmem:[%s5054_s7 + $0xf0] sm:$0xff]  }
 0x364   :  { %v1771_v12 = vadd.f32 %v4708_v0, %v1699_v23  ;;  %3709 = vmatmul.mubr.msk.bf16.vlgmr.msra.gmra.mrb[16].mxu0 %vm1960_vm4, %v1935_v40  ;;  %3738 = vmatprep.subr.bf16.mxu1 %v4131_v36  ;;  %v1786_v38 = vmax.f32 %v1770_v21, 0.0  ;;  %v4085_v40 = vld [vmem:[%s5054_s7 + $0xd8] sm:$0xff]   ;;  %v4086_v21 = vld [vmem:[%s5054_s7 + $0x120] sm:$0xff]   ;;  %v4088_v23 = vld [vmem:[%s5054_s7 + $0x128] sm:$0xff]  }
 0x365   :  { %v1789_v5 = vmax.f32 %v1773_v33, 0.0  ;;  %3725 = vmatpush3.bf16.msra.mxu0 %v4063_v20  ;;  %3732 = vmatprep.mubr.msk.bf16.mxu0 %vm4132_vm3, %v4131_v36  ;;  %v4084_v20 = vld [vmem:[%s5054_s7 + $0xf8] sm:$0xff]   ;;  %v4087_v33 = vld [vmem:[%s5054_s7 + $0x100] sm:$0xff]  }
 0x366   :  { %v1787_v26 = vmax.f32 %v1771_v12, 0.0  ;;  %3726 = vmatprep.subr.bf16.mxu0 %v4131_v36  ;;  %v4090_v12 = vld [vmem:[%s5054_s7 + $0x130] sm:$0xff]  }
 0x367   :  { %v4740_v41 = vpack.c.bf16 %v1789_v5, %v1788_v47  ;;  %3739 = vmatpush3.bf16.msra.mxu1 %v4064_v11  ;;  %v4089_v11 = vld [vmem:[%s5054_s7 + $0x108] sm:$0xff]   ;;  %v4091_v47 = vld [vmem:[%s5054_s7 + $0x110] sm:$0xff]   ;;  %v4092_v5 = vld [vmem:[%s5054_s7 + $0x138] sm:$0xff]  }
 0x368   :  { %v4745_v43 = vpack.c.bf16 %v1787_v26, %v1786_v38  ;;  %v3694_v44 = vpop.f32.mrb[12].mxu1  ;;  %3740 = vmatprep.subr.bf16.mxu1 %v4131_v36  ;;  %v4094_v38 = vld [vmem:[%s5054_s7 + $0x160] sm:$0xff]  }
 0x369   :  { %v1776_v28 = vadd.f32 %v3694_v44, %v4708_v0  ;;  %3727 = vmatpush3.bf16.msra.mxu0 %v4065_v37  ;;  %v1712_v30 = vpop.f32.mrb[13].mxu1  ;;  %v2416_v22 = vrot.slane %v4740_v41, 4  ;;  %v4093_v37 = vld [vmem:[%s5054_s7 + $0x118] sm:$0xff]   ;;  %v4098_v44 = vld [vmem:[%s5054_s7 + $0x170] sm:$0xff]  }
 0x36a   :  { %v1774_v31 = vadd.f32 %v4708_v0, %v1712_v30  ;;  %v3695_v48 = vpop.f32.mrb[14].mxu1  ;;  %3728 = vmatprep.subr.bf16.mxu0 %v4131_v36  ;;  %v4100_v30 = vld [vmem:[%s5054_s7 + $0x178] sm:$0xff]  }
 0x36b   :  { %v1777_v49 = vadd.f32 %v3695_v48, %v4708_v0  ;;  %3741 = vmatpush3.bf16.msra.mxu1 %v4066_v42  ;;  %v1715_v34 = vpop.f32.mrb[15].mxu1  ;;  %v1792_v52 = vmax.f32 %v1776_v28, 0.0  ;;  %v4096_v42 = vld [vmem:[%s5054_s7 + $0x168] sm:$0xff]   ;;  %v4099_v28 = vld [vmem:[%s5054_s7 + $0x150] sm:$0xff]  }
 0x36c   :  { %v1775_v24 = vadd.f32 %v4708_v0, %v1715_v34  ;;  %3742 = vmatprep.subr.bf16.mxu1 %v4131_v36  ;;  %v1790_v54 = vmax.f32 %v1774_v31, 0.0  ;;  %v4102_v31 = vld [vmem:[%s5054_s7 + $0x1a0] sm:$0xff]   ;;  %v4104_v34 = vld [vmem:[%s5054_s7 + $0x1a8] sm:$0xff]  }
 0x36d   :  { %v1793_v27 = vmax.f32 %v1777_v49, 0.0  ;;  %3729 = vmatpush3.bf16.msra.mxu0 %v4067_v45  ;;  %v4101_v45 = vld [vmem:[%s5054_s7 + $0x158] sm:$0xff]   ;;  %v4103_v49 = vld [vmem:[%s5054_s7 + $0x180] sm:$0xff]  }
 0x36e   :  { %v1791_v55 = vmax.f32 %v1775_v24, 0.0  ;;  %3730 = vmatprep.subr.bf16.mxu0 %v4131_v36  ;;  %v4106_v24 = vld [vmem:[%s5054_s7 + $0x1b0] sm:$0xff]  }
 0x36f   :  { %v4764_v56 = vpack.c.bf16 %v1793_v27, %v1792_v52  ;;  %3743 = vmatpush3.bf16.msra.mxu1 %v4068_v50  ;;  %v4105_v50 = vld [vmem:[%s5054_s7 + $0x188] sm:$0xff]   ;;  %v4107_v52 = vld [vmem:[%s5054_s7 + $0x190] sm:$0xff]   ;;  %v4108_v27 = vld [vmem:[%s5054_s7 + $0x1b8] sm:$0xff]  }
 0x370   :  { %v4770_v29 = vpack.c.bf16 %v1791_v55, %v1790_v54  ;;  %v3698_v60 = vpop.f32.mrb[16].mxu1  ;;  %3760 = vmatprep.subr.bf16.mxu1 %v4131_v36  ;;  %v4110_v54 = vld [vmem:[%s5054_s7 + $0x1e0] sm:$0xff]  }
 0x371   :  { %v1780_v18 = vadd.f32 %v3698_v60, %v4708_v0  ;;  %3731 = vmatpush3.bf16.msra.mxu0 %v4069_v53  ;;  %v1728_v51 = vpop.f32.mrb[17].mxu1  ;;  %v2692_v48 = vrot.slane %v4764_v56, 4  ;;  %v4109_v53 = vld [vmem:[%s5054_s7 + $0x198] sm:$0xff]   ;;  %v4115_v60 = vld [vmem:[%s5054_s7 + $0x1d0] sm:$0xff]  }
 0x372   :  { %v1778_v62 = vadd.f32 %v4708_v0, %v1728_v51  ;;  %3745 = vmatmul.mubr.msk.bf16.vlgmr.msra.gmra.mrb[24].mxu1 %vm1960_vm4, %v2140_v25  ;;  %v3699_v63 = vpop.f32.mrb[18].mxu1  ;;  %3748 = vmatprep.subr.bf16.mxu0 %v4131_v36  ;;  %v2554_v26 = vrot.slane %v4770_v29, 4  ;;  %v4113_v25 = vld [vmem:[%s5054_s7 + $0x1c8] sm:$0xff]   ;;  %v4117_v51 = vld [vmem:[%s5054_s7 + $0x1d8] sm:$0xff]  }
 0x373   :  { %v1781_v46 = vadd.f32 %v3699_v63, %v4708_v0  ;;  %3761 = vmatpush3.bf16.msra.mxu1 %v4070_v58  ;;  %v1731_v1 = vpop.f32.mrb[19].mxu1  ;;  %3768 = vmatprep.mubr.msk.bf16.mxu1 %vm4132_vm3, %v4131_v36  ;;  %v1796_v59 = vmax.f32 %v1780_v18, 0.0  ;;  %v4112_v58 = vld [vmem:[%s5054_s7 + $0x1e8] sm:$0xff]   ;;  %v4116_v18 = vld [vmem:[%s5054_s7 + $0x1f8] sm:$0xff]  }
 0x374   :  { %v1779_v2 = vadd.f32 %v4708_v0, %v1731_v1  ;;  %3733 = vmatmul.mubr.msk.bf16.vlgmr.msra.gmra.mrb[20].mxu0 %vm1960_vm4, %v4714_v13  ;;  %3762 = vmatprep.subr.bf16.mxu1 %v4131_v36  ;;  %v1794_v3 = vmax.f32 %v1778_v62, 0.0  ;;  %v2278_v13 = vrot.slane %v4745_v43, 4  ;;  %v4118_v62 = vld [vmem:[%s5056_s9] sm:$0xff]   ;;  %v4119_v63 = vld [vmem:[%s5056_s9 + $0x8] sm:$0xff]   ;;  %v4121_v1 = vld [vmem:[%s5056_s9 + $0x18] sm:$0xff]  }
 0x375   :  { %v1797_v8 = vmax.f32 %v1781_v46, 0.0  ;;  %3749 = vmatpush3.bf16.msra.mxu0 %v4071_v61  ;;  %3756 = vmatprep.mubr.msk.bf16.mxu0 %vm4132_vm3, %v4131_v36  ;;  %v4120_v46 = vld [vmem:[%s5056_s9 + $0x10] sm:$0xff]  }
 0x376   :  { %v1795_v4 = vmax.f32 %v1779_v2, 0.0  ;;  %3750 = vmatprep.subr.bf16.mxu0 %v4131_v36 }
 0x377   :  { %v4796_v0 = vpack.c.bf16 %v1797_v8, %v1796_v59  ;;  %3763 = vmatpush3.bf16.msra.mxu1 %v4072_v32 }
 0x378   :  { %v4801_v10 = vpack.c.bf16 %v1795_v4, %v1794_v3  ;;  %3764 = vmatprep.subr.bf16.mxu1 %v4131_v36 }
 0x379   :  { %3751 = vmatpush3.bf16.msra.mxu0 %v4073_v57  ;;  %v2968_v61 = vrot.slane %v4796_v0, 4 }
 0x37a   :  { %3752 = vmatprep.subr.bf16.mxu0 %v4131_v36  ;;  %v2830_v55 = vrot.slane %v4801_v10, 4 }
 0x37b   :  { %3765 = vmatpush3.bf16.msra.mxu1 %v4074_v35 }
 0x37c   :  { %3766 = vmatprep.subr.bf16.mxu1 %v4131_v36 }
 0x37d   :  { %3753 = vmatpush3.bf16.msra.mxu0 %v4075_v6 }
 0x37e   :  { %3754 = vmatprep.subr.bf16.mxu0 %v4131_v36 }
 0x37f   :  { %3767 = vmatpush3.bf16.msra.mxu1 %v4076_v7 }
 0x380   :  { %3784 = vmatprep.subr.bf16.mxu1 %v4131_v36 }
 0x381   :  { %3755 = vmatpush3.bf16.msra.mxu0 %v4077_v9 }
 0x382   :  { %3769 = vmatmul.mubr.msk.bf16.vlgmr.msra.gmra.mrb[28].mxu1 %vm1960_vm4, %v2278_v13  ;;  %3772 = vmatprep.subr.bf16.mxu0 %v4131_v36 }
 0x383   :  { %3785 = vmatpush3.bf16.msra.mxu1 %v4078_v39  ;;  %3792 = vmatprep.mubr.msk.bf16.mxu1 %vm4132_vm3, %v4131_v36 }
 0x384   :  { %3757 = vmatmul.mubr.msk.bf16.vlgmr.msra.gmra.mrb[24].mxu0 %vm1960_vm4, %v4745_v43  ;;  %3786 = vmatprep.subr.bf16.mxu1 %v4131_v36  ;;  %v4097_v43 = vld [vmem:[%s5054_s7 + $0x148] sm:$0xff]  }
 0x385   :  { %3773 = vmatpush3.bf16.msra.mxu0 %v4079_v14  ;;  %3780 = vmatprep.mubr.msk.bf16.mxu0 %vm4132_vm3, %v4131_v36 }
 0x386   :  { %3774 = vmatprep.subr.bf16.mxu0 %v4131_v36 }
 0x387   :  { %3787 = vmatpush3.bf16.msra.mxu1 %v4080_v15 }
 0x388   :  { %3788 = vmatprep.subr.bf16.mxu1 %v4131_v36 }
 0x389   :  { %3775 = vmatpush3.bf16.msra.mxu0 %v4081_v16 }
 0x38a   :  { %3776 = vmatprep.subr.bf16.mxu0 %v4131_v36 }
 0x38b   :  { %3789 = vmatpush3.bf16.msra.mxu1 %v4082_v17 }
 0x38c   :  { %3790 = vmatprep.subr.bf16.mxu1 %v4131_v36 }
 0x38d   :  { %3777 = vmatpush3.bf16.msra.mxu0 %v4083_v19 }
 0x38e   :  { %3778 = vmatprep.subr.bf16.mxu0 %v4131_v36 }
 0x38f   :  { %3791 = vmatpush3.bf16.msra.mxu1 %v4084_v20 }
 0x390   :  { %3808 = vmatprep.subr.bf16.mxu1 %v4131_v36 }
 0x391   :  { %3779 = vmatpush3.bf16.msra.mxu0 %v4085_v40 }
 0x392   :  { %3793 = vmatmul.mubr.msk.bf16.vlgmr.msra.gmra.mrb[32].mxu1 %vm1960_vm4, %v2416_v22  ;;  %3796 = vmatprep.subr.bf16.mxu0 %v4131_v36 }
 0x393   :  { %3809 = vmatpush3.bf16.msra.mxu1 %v4086_v21  ;;  %3816 = vmatprep.mubr.msk.bf16.mxu1 %vm4132_vm3, %v4131_v36 }
 0x394   :  { %3781 = vmatmul.mubr.msk.bf16.vlgmr.msra.gmra.mrb[28].mxu0 %vm1960_vm4, %v4740_v41  ;;  %3810 = vmatprep.subr.bf16.mxu1 %v4131_v36  ;;  %v4095_v41 = vld [vmem:[%s5054_s7 + $0x140] sm:$0xff]  }
 0x395   :  { %3797 = vmatpush3.bf16.msra.mxu0 %v4087_v33  ;;  %3804 = vmatprep.mubr.msk.bf16.mxu0 %vm4132_vm3, %v4131_v36 }
 0x396   :  { %3798 = vmatprep.subr.bf16.mxu0 %v4131_v36 }
 0x397   :  { %3811 = vmatpush3.bf16.msra.mxu1 %v4088_v23 }
 0x398   :  { %3812 = vmatprep.subr.bf16.mxu1 %v4131_v36 }
 0x399   :  { %3799 = vmatpush3.bf16.msra.mxu0 %v4089_v11 }
 0x39a   :  { %3800 = vmatprep.subr.bf16.mxu0 %v4131_v36 }
 0x39b   :  { %3813 = vmatpush3.bf16.msra.mxu1 %v4090_v12 }
 0x39c   :  { %3814 = vmatprep.subr.bf16.mxu1 %v4131_v36 }
 0x39d   :  { %3801 = vmatpush3.bf16.msra.mxu0 %v4091_v47 }
 0x39e   :  { %3802 = vmatprep.subr.bf16.mxu0 %v4131_v36 }
 0x39f   :  { %3815 = vmatpush3.bf16.msra.mxu1 %v4092_v5 }
 0x3a0   :  { %3832 = vmatprep.subr.bf16.mxu1 %v4131_v36 }
 0x3a1   :  { %3803 = vmatpush3.bf16.msra.mxu0 %v4093_v37 }
 0x3a2   :  { %3817 = vmatmul.mubr.msk.bf16.vlgmr.msra.gmra.mrb[36].mxu1 %vm1960_vm4, %v2554_v26  ;;  %3820 = vmatprep.subr.bf16.mxu0 %v4131_v36 }
 0x3a3   :  { %3833 = vmatpush3.bf16.msra.mxu1 %v4094_v38  ;;  %3840 = vmatprep.mubr.msk.bf16.mxu1 %vm4132_vm3, %v4131_v36 }
 0x3a4   :  { %3805 = vmatmul.mubr.msk.bf16.vlgmr.msra.gmra.mrb[32].mxu0 %vm1960_vm4, %v4770_v29  ;;  %3834 = vmatprep.subr.bf16.mxu1 %v4131_v36  ;;  %v4114_v29 = vld [vmem:[%s5054_s7 + $0x1f0] sm:$0xff]  }
 0x3a5   :  { %3821 = vmatpush3.bf16.msra.mxu0 %v4095_v41  ;;  %3828 = vmatprep.mubr.msk.bf16.mxu0 %vm4132_vm3, %v4131_v36 }
 0x3a6   :  { %3822 = vmatprep.subr.bf16.mxu0 %v4131_v36 }
 0x3a7   :  { %3835 = vmatpush3.bf16.msra.mxu1 %v4096_v42 }
 0x3a8   :  { %3836 = vmatprep.subr.bf16.mxu1 %v4131_v36 }
 0x3a9   :  { %3823 = vmatpush3.bf16.msra.mxu0 %v4097_v43 }
 0x3aa   :  { %3824 = vmatprep.subr.bf16.mxu0 %v4131_v36 }
 0x3ab   :  { %3837 = vmatpush3.bf16.msra.mxu1 %v4098_v44 }
 0x3ac   :  { %3838 = vmatprep.subr.bf16.mxu1 %v4131_v36 }
 0x3ad   :  { %3825 = vmatpush3.bf16.msra.mxu0 %v4099_v28 }
 0x3ae   :  { %3826 = vmatprep.subr.bf16.mxu0 %v4131_v36 }
 0x3af   :  { %3839 = vmatpush3.bf16.msra.mxu1 %v4100_v30 }
 0x3b0   :  { %3856 = vmatprep.subr.bf16.mxu1 %v4131_v36 }
 0x3b1   :  { %3827 = vmatpush3.bf16.msra.mxu0 %v4101_v45 }
 0x3b2   :  { %3841 = vmatmul.mubr.msk.bf16.vlgmr.msra.gmra.mrb[40].mxu1 %vm1960_vm4, %v2692_v48  ;;  %3844 = vmatprep.subr.bf16.mxu0 %v4131_v36 }
 0x3b3   :  { %3857 = vmatpush3.bf16.msra.mxu1 %v4102_v31  ;;  %3864 = vmatprep.mubr.msk.bf16.mxu1 %vm4132_vm3, %v4131_v36 }
 0x3b4   :  { %3829 = vmatmul.mubr.msk.bf16.vlgmr.msra.gmra.mrb[36].mxu0 %vm1960_vm4, %v4764_v56  ;;  %3858 = vmatprep.subr.bf16.mxu1 %v4131_v36  ;;  %v4111_v56 = vld [vmem:[%s5054_s7 + $0x1c0] sm:$0xff]  }
 0x3b5   :  { %3845 = vmatpush3.bf16.msra.mxu0 %v4103_v49  ;;  %3852 = vmatprep.mubr.msk.bf16.mxu0 %vm4132_vm3, %v4131_v36 }
 0x3b6   :  { %3846 = vmatprep.subr.bf16.mxu0 %v4131_v36 }
 0x3b7   :  { %3859 = vmatpush3.bf16.msra.mxu1 %v4104_v34 }
 0x3b8   :  { %3860 = vmatprep.subr.bf16.mxu1 %v4131_v36 }
 0x3b9   :  { %3847 = vmatpush3.bf16.msra.mxu0 %v4105_v50 }
 0x3ba   :  { %3848 = vmatprep.subr.bf16.mxu0 %v4131_v36 }
 0x3bb   :  { %3861 = vmatpush3.bf16.msra.mxu1 %v4106_v24 }
 0x3bc   :  { %3862 = vmatprep.subr.bf16.mxu1 %v4131_v36 }
 0x3bd   :  { %3849 = vmatpush3.bf16.msra.mxu0 %v4107_v52 }
 0x3be   :  { %3850 = vmatprep.subr.bf16.mxu0 %v4131_v36 }
 0x3bf   :  { %3863 = vmatpush3.bf16.msra.mxu1 %v4108_v27 }
 0x3c0   :  { %3880 = vmatprep.subr.bf16.mxu1 %v4131_v36 }
 0x3c1   :  { %3851 = vmatpush3.bf16.msra.mxu0 %v4109_v53 }
 0x3c2   :  { %3865 = vmatmul.mubr.msk.bf16.vlgmr.msra.gmra.mrb[44].mxu1 %vm1960_vm4, %v2830_v55  ;;  %3868 = vmatprep.subr.bf16.mxu0 %v4131_v36 }
 0x3c3   :  { %3881 = vmatpush3.bf16.msra.mxu1 %v4110_v54  ;;  %3888 = vmatprep.mubr.msk.bf16.mxu1 %vm4132_vm3, %v4131_v36 }
 0x3c4   :  { %3853 = vmatmul.mubr.msk.bf16.vlgmr.msra.gmra.mrb[40].mxu0 %vm1960_vm4, %v4801_v10  ;;  %3882 = vmatprep.subr.bf16.mxu1 %v4131_v36 }
 0x3c5   :  { %3869 = vmatpush3.bf16.msra.mxu0 %v4111_v56  ;;  %3876 = vmatprep.mubr.msk.bf16.mxu0 %vm4132_vm3, %v4131_v36 }
 0x3c6   :  { %3870 = vmatprep.subr.bf16.mxu0 %v4131_v36 }
 0x3c7   :  { %3883 = vmatpush3.bf16.msra.mxu1 %v4112_v58 }
 0x3c8   :  { %3884 = vmatprep.subr.bf16.mxu1 %v4131_v36 }
 0x3c9   :  { %3871 = vmatpush3.bf16.msra.mxu0 %v4113_v25 }
 0x3ca   :  { %3872 = vmatprep.subr.bf16.mxu0 %v4131_v36 }
 0x3cb   :  { %3885 = vmatpush3.bf16.msra.mxu1 %v4114_v29 }
 0x3cc   :  { %3886 = vmatprep.subr.bf16.mxu1 %v4131_v36 }
 0x3cd   :  { %3873 = vmatpush3.bf16.msra.mxu0 %v4115_v60 }
 0x3ce   :  { %3874 = vmatprep.subr.bf16.mxu0 %v4131_v36 }
 0x3cf   :  { %3887 = vmatpush3.bf16.msra.mxu1 %v4116_v18 }
 0x3d1   :  { %3875 = vmatpush3.bf16.msra.mxu0 %v4117_v51 }
 0x3d2   :  { %3889 = vmatmul.mubr.msk.bf16.vlgmr.msra.gmra.mrb[48].mxu1 %vm1960_vm4, %v2968_v61  ;;  %3892 = vmatprep.subr.bf16.mxu0 %v4131_v36 }
 0x3d4   :  { %3877 = vmatmul.mubr.msk.bf16.vlgmr.msra.gmra.mrb[44].mxu0 %vm1960_vm4, %v4796_v0 }
 0x3d5   :  { %3900 = vmatprep.mubr.msk.bf16.mxu0 %vm4132_vm3, %v4131_v36  ;;  %3893 = vmatpush3.bf16.msra.mxu0 %v4118_v62 }
 0x3d6   :  { %3894 = vmatprep.subr.bf16.mxu0 %v4131_v36 }
 0x3d9   :  { %3895 = vmatpush3.bf16.msra.mxu0 %v4119_v63 }
 0x3da   :  { %3896 = vmatprep.subr.bf16.mxu0 %v4131_v36 }
 0x3dd   :  { %3897 = vmatpush3.bf16.msra.mxu0 %v4120_v46 }
 0x3de   :  { %3898 = vmatprep.subr.bf16.mxu0 %v4131_v36 }
 0x3e1   :  { %3899 = vmatpush3.bf16.msra.mxu0 %v4121_v1 }
 0x435   :  { %v2065_v32 = vpop.f32.mrb[20].mxu1 }
 0x436   :  { %v3722_v2 = vpop.f32.mrb[21].mxu1 }
 0x437   :  { %v1998_v59 = vpop.f32.mrb[16].mxu0  ;;  %v2068_v8 = vpop.f32.mrb[22].mxu1 }
 0x438   :  { %v2066_v57 = vadd.f32 %v2065_v32, %v1998_v59  ;;  %v3710_v3 = vpop.f32.mrb[17].mxu0  ;;  %v3723_v4 = vpop.f32.mrb[23].mxu1 }
 0x439   :  { %v2001_v0 = vpop.f32.mrb[18].mxu0 }
 0x43a   :  { %v3711_v35 = vpop.f32.mrb[19].mxu0 }
 0x445   :  { %v2202_v10 = vpop.f32.mrb[24].mxu1 }
 0x446   :  { %v3746_v6 = vpop.f32.mrb[25].mxu1 }
 0x447   :  { %v2132_v7 = vpop.f32.mrb[20].mxu0  ;;  %v2205_v9 = vpop.f32.mrb[26].mxu1 }
 0x448   :  { %v2138_v39 = vadd.f32 %v2132_v7, %v2066_v57  ;;  %v3734_v36 = vpop.f32.mrb[21].mxu0  ;;  %v3747_v13 = vpop.f32.mrb[27].mxu1  ;;  %v3321_v9 = vld [vmem:[%s5057_s8] ss:$0 sm:$0xff] }
 0x449   :  { %v2135_v14 = vpop.f32.mrb[22].mxu0 }
 0x44a   :  { %v3735_v15 = vpop.f32.mrb[23].mxu0  ;;  %v2208_v16 = vadd.f32 %v2202_v10, %v2138_v39 }
 0x455   :  { %v2340_v17 = vpop.f32.mrb[28].mxu1 }
 0x456   :  { %v3770_v19 = vpop.f32.mrb[29].mxu1 }
 0x457   :  { %v2270_v20 = vpop.f32.mrb[24].mxu0  ;;  %v2343_v40 = vpop.f32.mrb[30].mxu1 }
 0x458   :  { %v2276_v21 = vadd.f32 %v2270_v20, %v2208_v16  ;;  %v3758_v22 = vpop.f32.mrb[25].mxu0  ;;  %v3771_v33 = vpop.f32.mrb[31].mxu1 }
 0x459   :  { %v2273_v23 = vpop.f32.mrb[26].mxu0 }
 0x45a   :  { %v3759_v11 = vpop.f32.mrb[27].mxu0  ;;  %v2346_v12 = vadd.f32 %v2340_v17, %v2276_v21  ;;  %v3322_v17 = vld [vmem:[%s5058_s10] ss:$0 sm:$0xff] }
 0x465   :  { %v2478_v47 = vpop.f32.mrb[32].mxu1 }
 0x466   :  { %v3794_v5 = vpop.f32.mrb[33].mxu1 }
 0x467   :  { %v2408_v37 = vpop.f32.mrb[28].mxu0  ;;  %v2481_v38 = vpop.f32.mrb[34].mxu1 }
 0x468   :  { %v2414_v26 = vadd.f32 %v2408_v37, %v2346_v12  ;;  %v3782_v41 = vpop.f32.mrb[29].mxu0  ;;  %v3795_v42 = vpop.f32.mrb[35].mxu1 }
 0x469   :  { %v2411_v43 = vpop.f32.mrb[30].mxu0 }
 0x46a   :  { %v3783_v44 = vpop.f32.mrb[31].mxu0  ;;  %v2484_v28 = vadd.f32 %v2478_v47, %v2414_v26 }
 0x475   :  { %v2616_v30 = vpop.f32.mrb[36].mxu1 }
 0x476   :  { %v3818_v45 = vpop.f32.mrb[37].mxu1 }
 0x477   :  { %v2546_v31 = vpop.f32.mrb[32].mxu0  ;;  %v2619_v48 = vpop.f32.mrb[38].mxu1 }
 0x478   :  { %v2552_v49 = vadd.f32 %v2546_v31, %v2484_v28  ;;  %v3806_v34 = vpop.f32.mrb[33].mxu0  ;;  %v3819_v50 = vpop.f32.mrb[39].mxu1 }
 0x479   :  { %v2549_v24 = vpop.f32.mrb[34].mxu0 }
 0x47a   :  { %v3807_v52 = vpop.f32.mrb[35].mxu0  ;;  %v2622_v27 = vadd.f32 %v2616_v30, %v2552_v49 }
 0x485   :  { %v2754_v53 = vpop.f32.mrb[40].mxu1 }
 0x486   :  { %v3842_v54 = vpop.f32.mrb[41].mxu1 }
 0x487   :  { %v2684_v55 = vpop.f32.mrb[36].mxu0  ;;  %v2757_v56 = vpop.f32.mrb[42].mxu1 }
 0x488   :  { %v2690_v58 = vadd.f32 %v2684_v55, %v2622_v27  ;;  %v3830_v25 = vpop.f32.mrb[37].mxu0  ;;  %v3843_v29 = vpop.f32.mrb[43].mxu1 }
 0x489   :  { %v2687_v60 = vpop.f32.mrb[38].mxu0 }
 0x48a   :  { %v3831_v18 = vpop.f32.mrb[39].mxu0  ;;  %v2760_v51 = vadd.f32 %v2754_v53, %v2690_v58 }
 0x495   :  { %v2892_v61 = vpop.f32.mrb[44].mxu1 }
 0x496   :  { %v3866_v62 = vpop.f32.mrb[45].mxu1 }
 0x497   :  { %v2822_v63 = vpop.f32.mrb[40].mxu0  ;;  %v2895_v46 = vpop.f32.mrb[46].mxu1 }
 0x498   :  { %v2828_v1 = vadd.f32 %v2822_v63, %v2760_v51  ;;  %v3854_v32 = vpop.f32.mrb[41].mxu0  ;;  %v3867_v2 = vpop.f32.mrb[47].mxu1 }
 0x499   :  { %v2825_v59 = vpop.f32.mrb[42].mxu0 }
 0x49a   :  { %v3855_v8 = vpop.f32.mrb[43].mxu0  ;;  %v2898_v57 = vadd.f32 %v2892_v61, %v2828_v1 }
 0x4a5   :  { %v3030_v3 = vpop.f32.mrb[48].mxu1 }
 0x4a6   :  { %v3890_v4 = vpop.f32.mrb[49].mxu1 }
 0x4a7   :  { %v2960_v0 = vpop.f32.mrb[44].mxu0  ;;  %v3033_v35 = vpop.f32.mrb[50].mxu1 }
 0x4a8   :  { %v2966_v10 = vadd.f32 %v2960_v0, %v2898_v57  ;;  %v3878_v6 = vpop.f32.mrb[45].mxu0  ;;  %v3891_v7 = vpop.f32.mrb[51].mxu1 }
 0x4a9   :  { %v2963_v39 = vpop.f32.mrb[46].mxu0 }
 0x4aa   :  { %v3036_v36 = vadd.f32 %v3030_v3, %v2966_v10  ;;  %v3879_v13 = vpop.f32.mrb[47].mxu0 }
 0x4ac   :  { %v3044_v14 = vadd.f32 %v3321_v9, %v3036_v36 }
 0x4ae   :  { %v3045_v15 = vmax.f32 %v3044_v14, 0.0 }
 0x4b0   :  { %v3046_v16 = vpack.c.bf16 %v3045_v15, %v3045_v15 }
 0x4b2   :  { %3901 = vmatmul.mubr.msk.bf16.vlgmr.msra.gmra.mrb[48].mxu0 %vm1960_vm4, %v3046_v16 }
 0x585   :  { %v3123_v19 = vpop.f32.mrb[48].mxu0 }
 0x586   :  { %v3124_v20 = vadd.f32 %v3322_v17, %v3123_v19  ;;  %v3902_v40 = vpop.f32.mrb[49].mxu0 }
 0x587   :  { %v3126_v21 = vpop.f32.mrb[50].mxu0 }
 0x588   :  { %v3328_v22 = vmul.f32 -1.442695, %v3124_v20  ;;  %v3903_v33 = vpop.f32.mrb[51].mxu0 }
 0x58a   :  { %4122 = vpow2.f32 %v3328_v22 }
 0x594   :  { %v4123_v23 = vpop.eup %4122 }
 0x595   :  { %v3132_v11 = vadd.f32 1.0, %v4123_v23 }
 0x597   :  { %4124 = vrcp.f32 %v3132_v11 }
 0x5a1   :  { %v4125_v12 = vpop.eup %4124 }
 0x5a2   :  { %v3329_v47 = vmul.f32 -1.442695, %v4125_v12 }
 0x5a4   :  { %4126 = vpow2.f32 %v3329_v47 }
 0x5ae   :  { %v4127_v5 = vpop.eup %4126 }
 0x5af   :  { %v3138_v37 = vadd.f32 1.0, %v4127_v5 }
 0x5b1   :  { %4128 = vrcp.f32 %v3138_v37 }
 0x5bb   :  { %v4129_v38 = vpop.eup %4128 }
 0x5bc   :  { %3142 = vst.msk [vmem:[%s5059_s11] sm:$0xff] %vm3141_vm5, %v4129_v38 }

</bundles_post_ra>
